<compile_context>
chip_gen: v6e
topology: v6e:2x2x1
jax: 0.10.0
libtpu: 0.0.40
codegen_flags: <defaults>
</compile_context>

<pallas_src>
import math

import jax
import jax.numpy as jnp
from jax.experimental import pallas as pl
from jax.experimental.pallas import tpu as pltpu


def _round_up(x, m):
    return ((x + m - 1) // m) * m


def _cdiv(a, b):
    return (a + b - 1) // b


def _predictor_kernel(
    s_ref,      # (TB, C_IN)      input tile (bf16 or f32)
    gamma_ref,  # (1, C_IN)       LayerNorm weight (f32)
    beta_ref,   # (1, C_IN)       LayerNorm bias   (f32)
    w1_ref,     # (C_IN, C_HID_P) linear_1 weight, bf16, hidden zero-padded
    b1_ref,     # (1, C_HID_P)    f32
    w2t_ref,    # (C_IN, C_HID_P) linear_2 weight (torch layout), bf16, padded
    b2_ref,     # (C_IN, 1)       f32 column (for the transposed layout)
    w3_ref,     # (C_IN, 1)       f32
    b3_ref,     # (1, 1)          f32
    out_ref,    # (1, TB)         lane-dense f32 sigmoid outputs
):
    x = s_ref[...].astype(jnp.float32)

    # ---- LayerNorm over last dim (eps = 1e-5, elementwise affine), all f32 ----
    mean = jnp.mean(x, axis=-1, keepdims=True)
    xc = x - mean
    var = jnp.mean(xc * xc, axis=-1, keepdims=True)
    xn = (xc * jax.lax.rsqrt(var + 1e-5)) * gamma_ref[...] + beta_ref[...]

    # ---- linear_1 + ReLU: bf16 MXU operands, f32 accumulate ----
    h1 = jnp.dot(xn.astype(jnp.bfloat16), w1_ref[...],
                 preferred_element_type=jnp.float32)
    h1 = jnp.maximum(h1 + b1_ref[...], 0.0)

    # ---- linear_2 computed transposed (avoids the big (TB, C_IN) transpose):
    # only the small (TB, C_HID_P) activation is transposed, in bf16.
    h1_t = h1.astype(jnp.bfloat16).T                        # (C_HID_P, TB)
    h2_t = jnp.dot(w2t_ref[...], h1_t,
                   preferred_element_type=jnp.float32)      # (C_IN, TB)
    h2_t = jnp.maximum(h2_t + b2_ref[...], 0.0)

    # ---- linear_3 (N=1): VPU multiply + sublane reduce -> lane-dense (1, TB) ----
    logit = jnp.sum(h2_t * w3_ref[...], axis=0, keepdims=True) + b3_ref[...]

    out_ref[...] = jax.nn.sigmoid(logit).astype(out_ref.dtype)


def predictor_forward(s, params, *, block_rows=2048, input_dtype=jnp.bfloat16):
    """Run the Predictor forward pass as a gridded Pallas kernel.

    Args:
      s: (B, c_in) input. It is cast to `input_dtype` (default bf16) before
         being streamed to the kernel; all LayerNorm / elementwise math is f32.
      params: dict with gamma, beta, w1, b1, w2, b2, w3, b3 (math layout, f32).
      block_rows: maximum batch tile size (multiple of 128).
      input_dtype: streamed input dtype (bf16 halves the dominant HBM stream;
         pass jnp.float32 for bit-tighter results).
    Returns:
      (B,) float32 sigmoid outputs (matches torch.sigmoid(s.flatten())).
    """
    assert block_rows % 128 == 0 and block_rows > 0
    B, c_in = s.shape
    c_hidden = params["w1"].shape[1]

    input_dtype = jnp.dtype(input_dtype)
    # v7x has only 64 MiB physical VMEM: cap f32-input tiles at 1024 rows.
    max_rows = block_rows if input_dtype.itemsize <= 2 else min(block_rows, 1024)

    # Zero-pad the hidden dim to a full-lane multiple of 128 (ReLU(0)=0 and the
    # matching zero columns of w2t keep this numerically identical).
    c_hid_p = _round_up(max(c_hidden, 1), 128)
    hid_pad = c_hid_p - c_hidden
    w1 = jnp.pad(params["w1"].astype(jnp.float32),
                 ((0, 0), (0, hid_pad))).astype(jnp.bfloat16)
    b1 = jnp.pad(params["b1"].astype(jnp.float32),
                 (0, hid_pad)).reshape(1, c_hid_p)
    # linear_2 weight kept in torch layout (c_in, c_hidden) so the second
    # matmul runs transposed: (c_in, c_hid_p) @ (c_hid_p, TB) -> (c_in, TB).
    w2t = jnp.pad(params["w2"].astype(jnp.float32).T,
                  ((0, 0), (0, hid_pad))).astype(jnp.bfloat16)
    b2 = params["b2"].astype(jnp.float32).reshape(c_in, 1)

    # Batch tiling: every tile full; when the batch is big enough, force >= 2
    # tiles so both v7x TensorCores get work under the "parallel" axis.
    b_pad0 = _round_up(B, 128)
    target = _round_up(_cdiv(b_pad0, 2), 128) if b_pad0 >= 256 else b_pad0
    tb = min(max_rows, target)
    b_pad = _round_up(B, tb)
    num_tiles = b_pad // tb

    s_cast = s.astype(input_dtype)
    s_pad = jnp.pad(s_cast, ((0, b_pad - B), (0, 0))) if b_pad != B else s_cast

    inputs = (
        s_pad,                                                  # (b_pad, c_in)
        params["gamma"].astype(jnp.float32).reshape(1, c_in),
        params["beta"].astype(jnp.float32).reshape(1, c_in),
        w1,                                                     # (c_in, c_hid_p) bf16
        b1,                                                     # (1, c_hid_p)
        w2t,                                                    # (c_in, c_hid_p) bf16
        b2,                                                     # (c_in, 1)
        params["w3"].astype(jnp.float32).reshape(c_in, 1),
        params["b3"].astype(jnp.float32).reshape(1, 1),
    )

    # Deepen the input pipeline only when the grid is long enough to use it.
    s_pipeline = {"pipeline_mode": pl.Buffered(3)} if num_tiles >= 3 else {}
    in_specs = [
        pl.BlockSpec((tb, c_in), lambda i: (i, 0), **s_pipeline),  # s (pipelined)
        pl.BlockSpec((1, c_in), lambda i: (0, 0)),                 # gamma
        pl.BlockSpec((1, c_in), lambda i: (0, 0)),                 # beta
        pl.BlockSpec((c_in, c_hid_p), lambda i: (0, 0)),           # w1
        pl.BlockSpec((1, c_hid_p), lambda i: (0, 0)),              # b1
        pl.BlockSpec((c_in, c_hid_p), lambda i: (0, 0)),           # w2t
        pl.BlockSpec((c_in, 1), lambda i: (0, 0)),                 # b2
        pl.BlockSpec((c_in, 1), lambda i: (0, 0)),                 # w3
        pl.BlockSpec((1, 1), lambda i: (0, 0)),                    # b3
    ]
    # Lane-dense output: each grid step writes a (1, tb) row segment.
    out_specs = pl.BlockSpec((1, tb), lambda i: (0, i))

    param_bytes = sum(int(a.size) * a.dtype.itemsize for a in inputs[1:])
    cost = pl.CostEstimate(
        flops=int(b_pad) * (4 * c_in * c_hid_p + 12 * c_in),
        transcendentals=2 * int(b_pad),                  # rsqrt + sigmoid per row
        bytes_accessed=int(b_pad) * c_in * input_dtype.itemsize
        + param_bytes + 4 * int(b_pad),
    )

    out = pl.pallas_call(
        _predictor_kernel,
        out_shape=jax.ShapeDtypeStruct((1, b_pad), jnp.float32),
        grid=(num_tiles,),
        in_specs=in_specs,
        out_specs=out_specs,
        compiler_params=pltpu.CompilerParams(
            # Batch tiles are independent -> megacore sharding on v7x.
            dimension_semantics=("parallel",),
            # Peak live VMEM (3 bf16 input bufs + intermediates at tb=2048)
            # stays well under this; leaves headroom under v7x's 64 MiB.
            vmem_limit_bytes=40 * 1024 * 1024,
        ),
        cost_estimate=cost,
    )(*inputs)

    return out.reshape(-1)[:B]


def init_params(key, c_in, c_hidden):
    """Deterministic parameter init mirroring torch defaults (Kaiming-uniform
    fan_in bounds for Linear weights/biases, ones/zeros for LayerNorm)."""
    ks = jax.random.split(key, 6)

    def linear(kw, kb, fan_in, fan_out):
        bound = 1.0 / math.sqrt(fan_in)
        w = jax.random.uniform(kw, (fan_in, fan_out), jnp.float32, -bound, bound)
        b = jax.random.uniform(kb, (fan_out,), jnp.float32, -bound, bound)
        return w, b

    w1, b1 = linear(ks[0], ks[1], c_in, c_hidden)
    w2, b2 = linear(ks[2], ks[3], c_hidden, c_in)
    w3, b3 = linear(ks[4], ks[5], c_in, 1)

    return {
        "gamma": jnp.ones((c_in,), jnp.float32),
        "beta": jnp.zeros((c_in,), jnp.float32),
        "w1": w1, "b1": b1,
        "w2": w2, "b2": b2,
        "w3": w3, "b3": b3,
    }


def _reference_forward(s, p):
    """Pure-JAX f32 reference for correctness checking."""
    mean = jnp.mean(s, axis=-1, keepdims=True)
    var = jnp.mean((s - mean) ** 2, axis=-1, keepdims=True)
    xn = (s - mean) * jax.lax.rsqrt(var + 1e-5) * p["gamma"] + p["beta"]
    h = jnp.maximum(xn @ p["w1"] + p["b1"], 0.0)
    h = jnp.maximum(h @ p["w2"] + p["b2"], 0.0)
    logit = h @ p["w3"] + p["b3"]
    return jax.nn.sigmoid(logit).reshape(-1)


if __name__ == "__main__":
    C_IN, C_HIDDEN = 512, 64          # module defaults
    key = jax.random.PRNGKey(0)
    k_x1, k_x2, k_p = jax.random.split(key, 3)
    params = init_params(k_p, C_IN, C_HIDDEN)

    def check(s, out, atol):
        # Reference sees the same bf16-quantized input the kernel streams; the
        # remaining difference is bf16 MXU-operand rounding (f32 accumulate).
        s_q = s.astype(jnp.bfloat16).astype(jnp.float32)
        ref = _reference_forward(s_q, params)
        assert out.shape == ref.shape, (out.shape, ref.shape)
        err = float(jnp.max(jnp.abs(out - ref)))
        assert jnp.allclose(out, ref, atol=atol), ("max abs err", err)

    # Small batch: pads to a single 128-row tile (num_tiles = 1).
    s_small = jax.random.normal(k_x1, (8, C_IN), dtype=jnp.float32)
    out_small = jax.block_until_ready(predictor_forward(s_small, params))
    assert out_small.shape == (8,)
    check(s_small, out_small, atol=2e-2)

    # Ragged larger batch, default tiling: 1000 rows -> two 512-row tiles
    # (megacore-balanced); exercises the multi-step grid + padded-tail slice.
    s_large = jax.random.normal(k_x2, (1000, C_IN), dtype=jnp.float32)
    out_large = jax.block_until_ready(predictor_forward(s_large, params))
    assert out_large.shape == (1000,)
    check(s_large, out_large, atol=2e-2)

    # Same batch with small tiles: 4 grid steps -> exercises the deeper
    # pl.Buffered(3) input pipeline path.
    out_tiles = jax.block_until_ready(
        predictor_forward(s_large, params, block_rows=256))
    check(s_large, out_tiles, atol=2e-2)

    # f32-input path: only bf16 MXU-operand rounding vs the pure-f32 reference.
    out_f32 = jax.block_until_ready(
        predictor_forward(s_large, params, input_dtype=jnp.float32))
    ref_f32 = _reference_forward(s_large, params)
    assert jnp.allclose(out_f32, ref_f32, atol=1e-2), (
        float(jnp.max(jnp.abs(out_f32 - ref_f32))))

    print("KERNEL_OK")
</pallas_src>

<mosaic_0001>
module attributes {stable_mosaic.version = 11 : i64} {
  func.func @_predictor_kernel(%arg0: i32, %arg1: memref<128x512xbf16, #tpu.memory_space<vmem>>, %arg2: memref<1x512xf32, #tpu.memory_space<vmem>>, %arg3: memref<1x512xf32, #tpu.memory_space<vmem>>, %arg4: memref<512x128xbf16, #tpu.memory_space<vmem>>, %arg5: memref<1x128xf32, #tpu.memory_space<vmem>>, %arg6: memref<512x128xbf16, #tpu.memory_space<vmem>>, %arg7: memref<512x1xf32, #tpu.memory_space<vmem>>, %arg8: memref<512x1xf32, #tpu.memory_space<vmem>>, %arg9: memref<1x1xf32, #tpu.memory_space<vmem>>, %arg10: memref<1x128xf32, #tpu.memory_space<vmem>>) attributes {dimension_semantics = [#tpu.dimension_semantics<parallel>], iteration_bounds = array<i64: 1>, scalar_prefetch = 0 : i64, scratch_operands = 0 : i64, tpu.core_type = #tpu.core_type<tc>, window_params = [{transform_indices = @transform_0, window_bounds = array<i64: 128, 512>}, {pipeline_mode = #tpu.pipeline_mode<synchronous>, transform_indices = @transform_1, window_bounds = array<i64: 1, 512>}, {pipeline_mode = #tpu.pipeline_mode<synchronous>, transform_indices = @transform_2, window_bounds = array<i64: 1, 512>}, {pipeline_mode = #tpu.pipeline_mode<synchronous>, transform_indices = @transform_3, window_bounds = array<i64: 512, 128>}, {pipeline_mode = #tpu.pipeline_mode<synchronous>, transform_indices = @transform_4, window_bounds = array<i64: 1, 128>}, {pipeline_mode = #tpu.pipeline_mode<synchronous>, transform_indices = @transform_5, window_bounds = array<i64: 512, 128>}, {pipeline_mode = #tpu.pipeline_mode<synchronous>, transform_indices = @transform_6, window_bounds = array<i64: 512, 1>}, {pipeline_mode = #tpu.pipeline_mode<synchronous>, transform_indices = @transform_7, window_bounds = array<i64: 512, 1>}, {pipeline_mode = #tpu.pipeline_mode<synchronous>, transform_indices = @transform_8, window_bounds = array<i64: 1, 1>}, {transform_indices = @transform_9, window_bounds = array<i64: 1, 128>}]} {
    %c0 = arith.constant 0 : index
    %c0_0 = arith.constant 0 : index
    %0 = vector.load %arg1[%c0, %c0_0] : memref<128x512xbf16, #tpu.memory_space<vmem>>, vector<128x512xbf16>
    %1 = arith.extf %0 : vector<128x512xbf16> to vector<128x512xf32>
    %cst = arith.constant dense<0.000000e+00> : vector<128xf32>
    %2 = vector.multi_reduction <add>, %1, %cst [1] : vector<128x512xf32> to vector<128xf32>
    %3 = vector.shape_cast %2 : vector<128xf32> to vector<128x1xf32>
    %cst_1 = arith.constant 5.120000e+02 : f32
    %4 = vector.broadcast %cst_1 : f32 to vector<128x1xf32>
    %5 = arith.divf %3, %4 : vector<128x1xf32>
    %6 = vector.broadcast %5 : vector<128x1xf32> to vector<128x512xf32>
    %7 = arith.subf %1, %6 : vector<128x512xf32>
    %8 = arith.mulf %7, %7 : vector<128x512xf32>
    %cst_2 = arith.constant dense<0.000000e+00> : vector<128xf32>
    %9 = vector.multi_reduction <add>, %8, %cst_2 [1] : vector<128x512xf32> to vector<128xf32>
    %10 = vector.shape_cast %9 : vector<128xf32> to vector<128x1xf32>
    %cst_3 = arith.constant 5.120000e+02 : f32
    %11 = vector.broadcast %cst_3 : f32 to vector<128x1xf32>
    %12 = arith.divf %10, %11 : vector<128x1xf32>
    %cst_4 = arith.constant 9.99999974E-6 : f32
    %13 = vector.broadcast %cst_4 : f32 to vector<128x1xf32>
    %14 = arith.addf %12, %13 : vector<128x1xf32>
    %15 = math.rsqrt %14 : vector<128x1xf32>
    %16 = vector.broadcast %15 : vector<128x1xf32> to vector<128x512xf32>
    %17 = arith.mulf %7, %16 : vector<128x512xf32>
    %c0_5 = arith.constant 0 : index
    %c0_6 = arith.constant 0 : index
    %18 = vector.load %arg2[%c0_5, %c0_6] : memref<1x512xf32, #tpu.memory_space<vmem>>, vector<1x512xf32>
    %19 = vector.broadcast %18 : vector<1x512xf32> to vector<128x512xf32>
    %20 = arith.mulf %17, %19 : vector<128x512xf32>
    %c0_7 = arith.constant 0 : index
    %c0_8 = arith.constant 0 : index
    %21 = vector.load %arg3[%c0_7, %c0_8] : memref<1x512xf32, #tpu.memory_space<vmem>>, vector<1x512xf32>
    %22 = vector.broadcast %21 : vector<1x512xf32> to vector<128x512xf32>
    %23 = arith.addf %20, %22 : vector<128x512xf32>
    %24 = arith.truncf %23 : vector<128x512xf32> to vector<128x512xbf16>
    %c0_9 = arith.constant 0 : index
    %c0_10 = arith.constant 0 : index
    %25 = vector.load %arg4[%c0_9, %c0_10] : memref<512x128xbf16, #tpu.memory_space<vmem>>, vector<512x128xbf16>
    %cst_11 = arith.constant dense<0.000000e+00> : vector<128x128xf32>
    %26 = tpu.matmul %24, %25, %cst_11 {dimension_numbers = #tpu.dot_dimension_numbers<[1], [0], [0], [1], [0, 0, 1, 1], [], []>} : vector<128x512xbf16>, vector<512x128xbf16>, vector<128x128xf32> -> vector<128x128xf32>
    %c0_12 = arith.constant 0 : index
    %c0_13 = arith.constant 0 : index
    %27 = vector.load %arg5[%c0_12, %c0_13] : memref<1x128xf32, #tpu.memory_space<vmem>>, vector<1x128xf32>
    %28 = vector.broadcast %27 : vector<1x128xf32> to vector<128x128xf32>
    %29 = arith.addf %26, %28 : vector<128x128xf32>
    %cst_14 = arith.constant 0.000000e+00 : f32
    %30 = vector.broadcast %cst_14 : f32 to vector<128x128xf32>
    %31 = arith.maximumf %29, %30 : vector<128x128xf32>
    %32 = arith.truncf %31 : vector<128x128xf32> to vector<128x128xbf16>
    %33 = tpu.transpose %32, [1, 0] : vector<128x128xbf16> -> vector<128x128xbf16>
    %c0_15 = arith.constant 0 : index
    %c0_16 = arith.constant 0 : index
    %34 = vector.load %arg6[%c0_15, %c0_16] : memref<512x128xbf16, #tpu.memory_space<vmem>>, vector<512x128xbf16>
    %cst_17 = arith.constant dense<0.000000e+00> : vector<512x128xf32>
    %35 = tpu.matmul %34, %33, %cst_17 {dimension_numbers = #tpu.dot_dimension_numbers<[1], [0], [0], [1], [0, 0, 1, 1], [], []>} : vector<512x128xbf16>, vector<128x128xbf16>, vector<512x128xf32> -> vector<512x128xf32>
    %c0_18 = arith.constant 0 : index
    %c0_19 = arith.constant 0 : index
    %36 = vector.load %arg7[%c0_18, %c0_19] : memref<512x1xf32, #tpu.memory_space<vmem>>, vector<512x1xf32>
    %37 = vector.broadcast %36 : vector<512x1xf32> to vector<512x128xf32>
    %38 = arith.addf %35, %37 : vector<512x128xf32>
    %cst_20 = arith.constant 0.000000e+00 : f32
    %39 = vector.broadcast %cst_20 : f32 to vector<512x128xf32>
    %40 = arith.maximumf %38, %39 : vector<512x128xf32>
    %c0_21 = arith.constant 0 : index
    %c0_22 = arith.constant 0 : index
    %41 = vector.load %arg8[%c0_21, %c0_22] : memref<512x1xf32, #tpu.memory_space<vmem>>, vector<512x1xf32>
    %42 = vector.broadcast %41 : vector<512x1xf32> to vector<512x128xf32>
    %43 = arith.mulf %40, %42 : vector<512x128xf32>
    %cst_23 = arith.constant dense<0.000000e+00> : vector<128xf32>
    %44 = vector.multi_reduction <add>, %43, %cst_23 [0] : vector<512x128xf32> to vector<128xf32>
    %45 = vector.shape_cast %44 : vector<128xf32> to vector<1x128xf32>
    %c0_24 = arith.constant 0 : index
    %c0_25 = arith.constant 0 : index
    %46 = vector.load %arg9[%c0_24, %c0_25] : memref<1x1xf32, #tpu.memory_space<vmem>>, vector<1x1xf32>
    %47 = vector.broadcast %46 : vector<1x1xf32> to vector<1x128xf32>
    %48 = arith.addf %45, %47 : vector<1x128xf32>
    %49 = arith.negf %48 : vector<1x128xf32>
    %50 = math.exp %49 : vector<1x128xf32>
    %cst_26 = arith.constant 1.000000e+00 : f32
    %51 = vector.broadcast %cst_26 : f32 to vector<1x128xf32>
    %52 = arith.addf %51, %50 : vector<1x128xf32>
    %53 = arith.divf %51, %52 : vector<1x128xf32>
    %c0_27 = arith.constant 0 : index
    %c0_28 = arith.constant 0 : index
    %54 = vector.load %arg10[%c0_27, %c0_28] : memref<1x128xf32, #tpu.memory_space<vmem>>, vector<1x128xf32>
    tpu.vector_store %arg10[%c0_27, %c0_28], %53 {strides = array<i32>} : memref<1x128xf32, #tpu.memory_space<vmem>>, vector<1x128xf32>,
    return
  }
  func.func @transform_0(%arg0: i32) -> (i32, i32) {
    %c0_i32 = arith.constant 0 : i32
    %c0_i32_0 = arith.constant 0 : i32
    return %arg0, %c0_i32 : i32, i32
  }
  func.func @transform_1(%arg0: i32) -> (i32, i32) {
    %c0_i32 = arith.constant 0 : i32
    %c0_i32_0 = arith.constant 0 : i32
    %c0_i32_1 = arith.constant 0 : i32
    return %c0_i32, %c0_i32_0 : i32, i32
  }
  func.func @transform_2(%arg0: i32) -> (i32, i32) {
    %c0_i32 = arith.constant 0 : i32
    %c0_i32_0 = arith.constant 0 : i32
    %c0_i32_1 = arith.constant 0 : i32
    return %c0_i32, %c0_i32_0 : i32, i32
  }
  func.func @transform_3(%arg0: i32) -> (i32, i32) {
    %c0_i32 = arith.constant 0 : i32
    %c0_i32_0 = arith.constant 0 : i32
    %c0_i32_1 = arith.constant 0 : i32
    return %c0_i32, %c0_i32_0 : i32, i32
  }
  func.func @transform_4(%arg0: i32) -> (i32, i32) {
    %c0_i32 = arith.constant 0 : i32
    %c0_i32_0 = arith.constant 0 : i32
    %c0_i32_1 = arith.constant 0 : i32
    return %c0_i32, %c0_i32_0 : i32, i32
  }
  func.func @transform_5(%arg0: i32) -> (i32, i32) {
    %c0_i32 = arith.constant 0 : i32
    %c0_i32_0 = arith.constant 0 : i32
    %c0_i32_1 = arith.constant 0 : i32
    return %c0_i32, %c0_i32_0 : i32, i32
  }
  func.func @transform_6(%arg0: i32) -> (i32, i32) {
    %c0_i32 = arith.constant 0 : i32
    %c0_i32_0 = arith.constant 0 : i32
    %c0_i32_1 = arith.constant 0 : i32
    return %c0_i32, %c0_i32_0 : i32, i32
  }
  func.func @transform_7(%arg0: i32) -> (i32, i32) {
    %c0_i32 = arith.constant 0 : i32
    %c0_i32_0 = arith.constant 0 : i32
    %c0_i32_1 = arith.constant 0 : i32
    return %c0_i32, %c0_i32_0 : i32, i32
  }
  func.func @transform_8(%arg0: i32) -> (i32, i32) {
    %c0_i32 = arith.constant 0 : i32
    %c0_i32_0 = arith.constant 0 : i32
    %c0_i32_1 = arith.constant 0 : i32
    return %c0_i32, %c0_i32_0 : i32, i32
  }
  func.func @transform_9(%arg0: i32) -> (i32, i32) {
    %c0_i32 = arith.constant 0 : i32
    %c0_i32_0 = arith.constant 0 : i32
    return %c0_i32, %arg0 : i32, i32
  }
}

</mosaic_0001>

<bundles_post_ra>
// kernel: tpu_custom_call.1
= control target key start
LH: loop header
LB: loop body
LE: loop exit
PB: predicated region body
PF: predicated region fallthrough
CT: control target
= control target key end

     0   :  { %s5379_s0 = inlined_call_operand.vmem [shape: bf16[128,512], index: 0, kind: input, shape index: {}]   ;;  %s5380_s1 = inlined_call_operand.vmem [shape: f32[1,512], index: 1, kind: input, shape index: {}]   ;;  %s5381_s2 = inlined_call_operand.vmem [shape: f32[1,512], index: 2, kind: input, shape index: {}]   ;;  %s5382_s3 = inlined_call_operand.vmem [shape: bf16[512,128], index: 3, kind: input, shape index: {}]   ;;  %s5383_s4 = inlined_call_operand.vmem [shape: f32[1,128], index: 4, kind: input, shape index: {}]   ;;  %s5384_s5 = inlined_call_operand.vmem [shape: bf16[512,128], index: 5, kind: input, shape index: {}]   ;;  %s5385_s6 = inlined_call_operand.vmem [shape: f32[512,1], index: 6, kind: input, shape index: {}]   ;;  %s5386_s7 = inlined_call_operand.vmem [shape: f32[512,1], index: 7, kind: input, shape index: {}]   ;;  %s5387_s8 = inlined_call_operand.<no memory space> [shape: f32[1,1], index: 8, kind: input, shape index: {}]   ;;  %s5388_s9 = inlined_call_operand.hbm [shape: f32[1,128], index: 9, kind: output, shape index: {}]  }
   0x1   :  { %v14_v0 = vstv %s5387_s8 }
   0x2   :  { %15 = vst [vmem:[#allocation2] sm:$0x1] %v14_v0 }
   0x3   :  { %v3290_v1 = vld [vmem:[%s5379_s0] sm:$0xff]  ;;  %v3295_v2 = vld [vmem:[%s5379_s0 + $0x8] sm:$0xff]  ;;  %v3314_v9 = vld [vmem:[%s5379_s0 + $0x10] sm:$0xff] }
   0x4   :  { %v3300_v3 = vld [vmem:[%s5379_s0 + $0x20] sm:$0xff]  ;;  %v68_v4 = vunpack.c.l.bf16 %v3290_v1  ;;  %v69_v5 = vunpack.c.h.bf16 %v3290_v1  ;;  %v70_v6 = vunpack.c.l.bf16 %v3295_v2  ;;  %v71_v7 = vunpack.c.h.bf16 %v3295_v2  ;;  %v3309_v8 = vld [vmem:[%s5379_s0 + $0x28] sm:$0xff]  ;;  %v3319_v10 = vld [vmem:[%s5379_s0 + $0x18] sm:$0xff] }
   0x5   :  { %v76_v11 = vunpack.c.l.bf16 %v3300_v3  ;;  %v77_v12 = vunpack.c.h.bf16 %v3300_v3  ;;  %v78_v13 = vunpack.c.l.bf16 %v3309_v8  ;;  %v79_v14 = vunpack.c.h.bf16 %v3309_v8  ;;  %v3328_v15 = vld [vmem:[%s5379_s0 + $0x30] sm:$0xff]  ;;  %v3333_v16 = vld [vmem:[%s5379_s0 + $0x38] sm:$0xff]  ;;  %v3345_v21 = vld [vmem:[%s5379_s0 + $0x40] sm:$0xff] }
   0x6   :  { %v132_v17 = vadd.f32 %v69_v5, %v68_v4  ;;  %v72_v18 = vunpack.c.l.bf16 %v3314_v9  ;;  %v73_v19 = vunpack.c.h.bf16 %v3314_v9  ;;  %v74_v20 = vunpack.c.l.bf16 %v3319_v10  ;;  %v3357_v26 = vld [vmem:[%s5379_s0 + $0x48] sm:$0xff]  ;;  %v3370_v31 = vld [vmem:[%s5379_s0 + $0x50] sm:$0xff]  ;;  %v3383_v36 = vld [vmem:[%s5379_s0 + $0x58] sm:$0xff] }
   0x7   :  { %v142_v22 = vadd.f32 %v77_v12, %v76_v11  ;;  %v75_v23 = vunpack.c.h.bf16 %v3319_v10  ;;  %v5424_v24 = vunpack.c.l.bf16 %v3328_v15  ;;  %v5423_v25 = vunpack.c.h.bf16 %v3328_v15  ;;  %v3393_v40 = vld [vmem:[%s5379_s0 + $0x60] sm:$0xff]  ;;  %v3407_v45 = vld [vmem:[%s5379_s0 + $0x68] sm:$0xff]  ;;  %v3412_v46 = vld [vmem:[%s5379_s0 + $0x70] sm:$0xff] }
   0x8   :  { %v133_v27 = vadd.f32 %v132_v17, %v70_v6  ;;  %v137_v28 = vadd.f32 %v73_v19, %v72_v18  ;;  %v5416_v29 = vunpack.c.l.bf16 %v3333_v16  ;;  %v5414_v30 = vunpack.c.h.bf16 %v3333_v16  ;;  %v3422_v51 = vld [vmem:[%s5379_s0 + $0x78] sm:$0xff]  ;;  %v3427_v52 = vld [vmem:[%s5379_s0 + $0x80] sm:$0xff]  ;;  %v3438_v57 = vld [vmem:[%s5379_s0 + $0x88] sm:$0xff] }
   0x9   :  { %v143_v32 = vadd.f32 %v142_v22, %v78_v13  ;;  %v147_v33 = vadd.f32 %v5423_v25, %v5424_v24  ;;  %v5413_v34 = vunpack.c.l.bf16 %v3345_v21  ;;  %v5412_v35 = vunpack.c.h.bf16 %v3345_v21  ;;  %v3443_v58 = vld [vmem:[%s5379_s0 + $0x90] sm:$0xff]  ;;  %v3455_v63 = vld [vmem:[%s5379_s0 + $0x98] sm:$0xff] }
   0xa   :  { %v134_v37 = vadd.f32 %v133_v27, %v71_v7  ;;  %v138_v38 = vadd.f32 %v137_v28, %v74_v20  ;;  %v5407_v39 = vunpack.c.l.bf16 %v3357_v26  ;;  %v5404_v44 = vunpack.c.l.bf16 %v3370_v31  ;;  %v3467_v28 = vld [vmem:[%s5379_s0 + $0xa0] sm:$0xff] }
   0xb   :  { %v144_v41 = vadd.f32 %v143_v32, %v79_v14  ;;  %v148_v42 = vadd.f32 %v147_v33, %v5416_v29  ;;  %v152_v43 = vadd.f32 %v5412_v35, %v5413_v34  ;;  %v5406_v48 = vunpack.c.h.bf16 %v3357_v26  ;;  %v3592_v29 = vld [vmem:[%s5379_s0 + $0xf8] sm:$0xff] }
   0xc   :  { %135 = vadd.xlane.f32.xlu0 %v134_v37  ;;  %v139_v47 = vadd.f32 %v138_v38, %v75_v23  ;;  %v5401_v49 = vunpack.c.h.bf16 %v3370_v31  ;;  %v5397_v50 = vunpack.c.l.bf16 %v3383_v36  ;;  %v5390_v55 = vunpack.c.l.bf16 %v3393_v40 }
   0xd   :  { %145 = vadd.xlane.f32.xlu1 %v144_v41  ;;  %v149_v53 = vadd.f32 %v148_v42, %v5414_v30  ;;  %v153_v54 = vadd.f32 %v152_v43, %v5407_v39  ;;  %v5389_v56 = vunpack.c.h.bf16 %v3393_v40  ;;  %v5396_v59 = vunpack.c.h.bf16 %v3383_v36  ;;  %v3478_v41 = vld [vmem:[%s5379_s0 + $0xa8] sm:$0xff]  ;;  %v3483_v42 = vld [vmem:[%s5379_s0 + $0xb0] sm:$0xff] }
   0xe   :  { %v157_v60 = vadd.f32 %v5401_v49, %v5404_v44  ;;  %v5391_v61 = vunpack.c.l.bf16 %v3407_v45  ;;  %v5395_v62 = vunpack.c.l.bf16 %v3412_v46  ;;  %v5399_v0 = vunpack.c.h.bf16 %v3407_v45 }
   0xf   :  { %v162_v17 = vadd.f32 %v5389_v56, %v5390_v55  ;;  %v5392_v22 = vunpack.c.h.bf16 %v3412_v46  ;;  %v5398_v27 = vunpack.c.l.bf16 %v3422_v51  ;;  %v154_v32 = vadd.f32 %v153_v54, %v5406_v48 }
  0x10   :  { %140 = vadd.xlane.f32.xlu0 %v139_v47  ;;  %v158_v33 = vadd.f32 %v157_v60, %v5397_v50  ;;  %v5394_v37 = vunpack.c.l.bf16 %v3427_v52  ;;  %v5393_v38 = vunpack.c.h.bf16 %v3427_v52  ;;  %v5405_v47 = vunpack.c.h.bf16 %v3422_v51 }
  0x11   :  { %150 = vadd.xlane.f32.xlu1 %v149_v53  ;;  %v163_v43 = vadd.f32 %v162_v17, %v5391_v61  ;;  %v167_v54 = vadd.f32 %v5392_v22, %v5395_v62  ;;  %v5400_v60 = vunpack.c.l.bf16 %v3438_v57  ;;  %v5403_v55 = vunpack.c.l.bf16 %v3443_v58  ;;  %v3504_v61 = vld [vmem:[%s5379_s0 + $0xb8] sm:$0xff]  ;;  %v3509_v22 = vld [vmem:[%s5379_s0 + $0xc0] sm:$0xff] }
  0x12   :  { %v159_v56 = vadd.f32 %v158_v33, %v5396_v59  ;;  %v172_v53 = vadd.f32 %v5393_v38, %v5394_v37  ;;  %v5402_v17 = vunpack.c.h.bf16 %v3443_v58  ;;  %v5411_v37 = vunpack.c.h.bf16 %v3438_v57  ;;  %v3520_v59 = vld [vmem:[%s5379_s0 + $0xc8] sm:$0xff] }
  0x13   :  { %v164_v33 = vadd.f32 %v163_v43, %v5399_v0  ;;  %v168_v38 = vadd.f32 %v167_v54, %v5398_v27  ;;  %v5408_v62 = vunpack.c.l.bf16 %v3455_v63  ;;  %v5410_v54 = vunpack.c.l.bf16 %v3467_v28  ;;  %v3533_v0 = vld [vmem:[%s5379_s0 + $0xd0] sm:$0xff] }
  0x14   :  { %155 = vadd.xlane.f32.xlu0 %v154_v32  ;;  %v173_v50 = vadd.f32 %v172_v53, %v5400_v60  ;;  %v177_v43 = vadd.f32 %v5402_v17, %v5403_v55  ;;  %v5409_v27 = vunpack.c.h.bf16 %v3467_v28  ;;  %v5421_v53 = vunpack.c.h.bf16 %v3455_v63  ;;  %v3543_v17 = vld [vmem:[%s5379_s0 + $0xd8] sm:$0xff] }
  0x15   :  { %160 = vadd.xlane.f32.xlu1 %v159_v56  ;;  %v169_v32 = vadd.f32 %v168_v38, %v5405_v47  ;;  %v5415_v60 = vunpack.c.l.bf16 %v3478_v41  ;;  %v5418_v49 = vunpack.c.l.bf16 %v3483_v42  ;;  %v5440_v44 = vunpack.c.h.bf16 %v3478_v41  ;;  %v3556_v47 = vld [vmem:[%s5379_s0 + $0xe0] sm:$0xff] }
  0x16   :  { %v178_v55 = vadd.f32 %v177_v43, %v5408_v62  ;;  %v182_v56 = vadd.f32 %v5409_v27, %v5410_v54  ;;  %v5417_v38 = vunpack.c.h.bf16 %v3483_v42  ;;  %v174_v48 = vadd.f32 %v173_v50, %v5411_v37  ;;  %v3566_v27 = vld [vmem:[%s5379_s0 + $0xe8] sm:$0xff]  ;;  %v3571_v54 = vld [vmem:[%s5379_s0 + $0xf0] sm:$0xff] }
  0x17   :  { %v5422_v39 = vunpack.c.l.bf16 %v3504_v61  ;;  %v5420_v43 = vunpack.c.l.bf16 %v3509_v22  ;;  %v5419_v62 = vunpack.c.h.bf16 %v3509_v22  ;;  %v5439_v37 = vunpack.c.h.bf16 %v3504_v61 }
  0x18   :  { %165 = vadd.xlane.f32.xlu0 %v164_v33  ;;  %v183_v50 = vadd.f32 %v182_v56, %v5415_v60  ;;  %v187_v35 = vadd.f32 %v5417_v38, %v5418_v49  ;;  %v5430_v34 = vunpack.c.l.bf16 %v3520_v59  ;;  %v179_v30 = vadd.f32 %v178_v55, %v5421_v53 }
  0x19   :  { %170 = vadd.xlane.f32.xlu1 %v169_v32  ;;  %v192_v33 = vadd.f32 %v5419_v62, %v5420_v43  ;;  %v5426_v56 = vunpack.c.l.bf16 %v3533_v0  ;;  %v5425_v60 = vunpack.c.h.bf16 %v3533_v0  ;;  %v5438_v38 = vunpack.c.h.bf16 %v3520_v59 }
  0x1a   :  { %v188_v32 = vadd.f32 %v187_v35, %v5422_v39  ;;  %v5427_v55 = vunpack.c.l.bf16 %v3543_v17  ;;  %v184_v49 = vadd.f32 %v183_v50, %v5440_v44  ;;  %v5429_v43 = vunpack.c.l.bf16 %v3556_v47 }
  0x1b   :  { %v197_v62 = vadd.f32 %v5425_v60, %v5426_v56  ;;  %v5428_v53 = vunpack.c.h.bf16 %v3556_v47  ;;  %v193_v35 = vadd.f32 %v192_v33, %v5430_v34  ;;  %v5437_v39 = vunpack.c.h.bf16 %v3543_v17 }
  0x1c   :  { %175 = vadd.xlane.f32.xlu0 %v174_v48  ;;  %v5436_v25 = vunpack.c.l.bf16 %v3566_v27  ;;  %v5434_v24 = vunpack.c.l.bf16 %v3571_v54  ;;  %v189_v50 = vadd.f32 %v188_v32, %v5439_v37  ;;  %v5433_v33 = vunpack.c.h.bf16 %v3571_v54 }
  0x1d   :  { %180 = vadd.xlane.f32.xlu1 %v179_v30  ;;  %v198_v60 = vadd.f32 %v197_v62, %v5427_v55  ;;  %v202_v48 = vadd.f32 %v5428_v53, %v5429_v43  ;;  %v5432_v56 = vunpack.c.l.bf16 %v3592_v29  ;;  %v194_v32 = vadd.f32 %v193_v35, %v5438_v38 }
  0x1e   :  { %v207_v30 = vadd.f32 %v5433_v33, %v5434_v24  ;;  %v5435_v62 = vunpack.c.h.bf16 %v3566_v27  ;;  %v5431_v43 = vunpack.c.h.bf16 %v3592_v29 }
  0x1f   :  { %v203_v55 = vadd.f32 %v202_v48, %v5436_v25  ;;  %v199_v53 = vadd.f32 %v198_v60, %v5437_v39 }
  0x20   :  { %185 = vadd.xlane.f32.xlu0 %v184_v49  ;;  %v208_v34 = vadd.f32 %v207_v30, %v5432_v56 }
  0x21   :  { %190 = vadd.xlane.f32.xlu1 %v189_v50  ;;  %v204_v49 = vadd.f32 %v203_v55, %v5435_v62 }
  0x22   :  { %v209_v35 = vadd.f32 %v208_v34, %v5431_v43 }
  0x24   :  { %195 = vadd.xlane.f32.xlu0 %v194_v32 }
  0x25   :  { %200 = vadd.xlane.f32.xlu1 %v199_v53 }
  0x28   :  { %205 = vadd.xlane.f32.xlu0 %v204_v49 }
  0x29   :  { %210 = vadd.xlane.f32.xlu1 %v209_v35 }
  0x2a   :  { %16 = vsyncpa [#allocation4], 0  ;;  %v3110_v60 = vld [vmem:[%s5382_s3 + $0x78] sm:$0xff]   ;;  %v5471_v62 = vunpack.c.h.bf16 %v3333_v16  ;;  %v5477_v38 = vunpack.c.h.bf16 %v3357_v26 }
  0x2b   :  { %v3111_v50 = vld [vmem:[%s5382_s3 + $0xf8] sm:$0xff]   ;;  %2842 = vmatprep.subr.bf16.mxu0 %v3110_v60 }
  0x2c   :  { %2906 = vmatprep.subr.bf16.mxu1 %v3111_v50 }
  0x95   :  { %v136_v48 = vpop.xlane.xlu0 %135 }
  0x96   :  { %v213_v30 = vmul.f32 0.001953125, %v136_v48  ;;  %v146_v55 = vpop.xlane.xlu1 %145 }
  0x97   :  { %v215_v53 = vmul.f32 0.001953125, %v146_v55 }
  0x98   :  { %v3647_v34 = vsub.f32 %v68_v4, %v213_v30  ;;  %v3651_v32 = vsub.f32 %v69_v5, %v213_v30  ;;  %v3655_v49 = vsub.f32 %v70_v6, %v213_v30  ;;  %v3659_v35 = vsub.f32 %v71_v7, %v213_v30 }
  0x99   :  { %v141_v60 = vpop.xlane.xlu0 %140  ;;  %v3663_v50 = vsub.f32 %v76_v11, %v215_v53  ;;  %v3667_v4 = vsub.f32 %v77_v12, %v215_v53  ;;  %v3671_v1 = vsub.f32 %v78_v13, %v215_v53  ;;  %v3675_v5 = vsub.f32 %v79_v14, %v215_v53 }
  0x9a   :  { %v214_v2 = vmul.f32 0.001953125, %v141_v60  ;;  %v151_v6 = vpop.xlane.xlu1 %150  ;;  %v293_v7 = vmul.f32 %v3647_v34, %v3647_v34  ;;  %v294_v11 = vmul.f32 %v3651_v32, %v3651_v32  ;;  %v295_v3 = vmul.f32 %v3655_v49, %v3655_v49 }
  0x9b   :  { %v216_v12 = vmul.f32 0.001953125, %v151_v6  ;;  %v296_v13 = vmul.f32 %v3659_v35, %v3659_v35  ;;  %v301_v8 = vmul.f32 %v3663_v50, %v3663_v50  ;;  %v302_v14 = vmul.f32 %v3667_v4, %v3667_v4 }
  0x9c   :  { %v357_v48 = vadd.f32 %v294_v11, %v293_v7  ;;  %v303_v30 = vmul.f32 %v3671_v1, %v3671_v1  ;;  %v304_v55 = vmul.f32 %v3675_v5, %v3675_v5  ;;  %v3695_v53 = vsub.f32 %v72_v18, %v214_v2 }
  0x9d   :  { %v156_v60 = vpop.xlane.xlu0 %155  ;;  %v367_v6 = vadd.f32 %v302_v14, %v301_v8  ;;  %v3699_v43 = vsub.f32 %v73_v19, %v214_v2  ;;  %v3703_v56 = vsub.f32 %v74_v20, %v214_v2  ;;  %v3707_v7 = vsub.f32 %v75_v23, %v214_v2 }
  0x9e   :  { %v217_v11 = vmul.f32 0.001953125, %v156_v60  ;;  %v161_v33 = vpop.xlane.xlu1 %160  ;;  %v358_v24 = vadd.f32 %v357_v48, %v295_v3  ;;  %v297_v18 = vmul.f32 %v3695_v53, %v3695_v53  ;;  %v5468_v8 = vunpack.c.l.bf16 %v3328_v15 }
  0x9f   :  { %v218_v9 = vmul.f32 0.001953125, %v161_v33  ;;  %v368_v19 = vadd.f32 %v367_v6, %v303_v30  ;;  %v298_v20 = vmul.f32 %v3699_v43, %v3699_v43  ;;  %v299_v10 = vmul.f32 %v3703_v56, %v3703_v56 }
  0xa0   :  { %v3713_v14 = vsub.f32 %v5468_v8, %v216_v12  ;;  %v359_v23 = vadd.f32 %v358_v24, %v296_v13  ;;  %v300_v2 = vmul.f32 %v3707_v7, %v3707_v7  ;;  %v5469_v3 = vunpack.c.h.bf16 %v3328_v15 }
  0xa1   :  { %v5470_v60 = vunpack.c.l.bf16 %v3333_v16  ;;  %v166_v33 = vpop.xlane.xlu0 %165  ;;  %v369_v30 = vadd.f32 %v368_v19, %v304_v55  ;;  %v362_v6 = vadd.f32 %v298_v20, %v297_v18  ;;  %v3731_v25 = vsub.f32 %v5471_v62, %v216_v12 }
  0xa2   :  { %v3723_v48 = vsub.f32 %v5469_v3, %v216_v12  ;;  %v305_v24 = vmul.f32 %v3713_v14, %v3713_v14  ;;  %v219_v13 = vmul.f32 0.001953125, %v166_v33  ;;  %360 = vadd.xlane.f32.xlu0 %v359_v23  ;;  %v171_v39 = vpop.xlane.xlu1 %170  ;;  %v5475_v23 = vunpack.c.l.bf16 %v3357_v26 }
  0xa3   :  { %v3727_v8 = vsub.f32 %v5470_v60, %v216_v12  ;;  %v5472_v60 = vunpack.c.l.bf16 %v3345_v21  ;;  %v220_v18 = vmul.f32 0.001953125, %v171_v39  ;;  %v363_v16 = vadd.f32 %v362_v6, %v299_v10 }
  0xa4   :  { %v306_v15 = vmul.f32 %v3723_v48, %v3723_v48  ;;  %v308_v62 = vmul.f32 %v3731_v25, %v3731_v25  ;;  %v5474_v12 = vunpack.c.h.bf16 %v3345_v21  ;;  %v3751_v33 = vsub.f32 %v5475_v23, %v217_v11 }
  0xa5   :  { %v307_v3 = vmul.f32 %v3727_v8, %v3727_v8  ;;  %v3741_v55 = vsub.f32 %v5472_v60, %v217_v11  ;;  %v3755_v37 = vsub.f32 %v5477_v38, %v217_v11  ;;  %v176_v10 = vpop.xlane.xlu0 %175  ;;  %v364_v6 = vadd.f32 %v363_v16, %v300_v2 }
  0xa6   :  { %v3747_v19 = vsub.f32 %v5474_v12, %v217_v11  ;;  %v372_v20 = vadd.f32 %v306_v15, %v305_v24  ;;  %5476 = vst [vmem:[#allocation7_spill] sm:$0xff] %v3751_v33  ;;  %v5478_v21 = vunpack.c.l.bf16 %v3370_v31  ;;  %v5480_v24 = vunpack.c.h.bf16 %v3370_v31  ;;  %370 = vadd.xlane.f32.xlu0 %v369_v30  ;;  %v181_v26 = vpop.xlane.xlu1 %180 }
  0xa7   :  { %5473 = vst [vmem:[#allocation6_spill] sm:$0xff] %v3741_v55  ;;  %v309_v39 = vmul.f32 %v3741_v55, %v3741_v55  ;;  %v221_v23 = vmul.f32 0.001953125, %v176_v10  ;;  %v311_v11 = vmul.f32 %v3751_v33, %v3751_v33  ;;  %v312_v2 = vmul.f32 %v3755_v37, %v3755_v37  ;;  %365 = vadd.xlane.f32.xlu1 %v364_v6 }
  0xa8   :  { %v310_v60 = vmul.f32 %v3747_v19, %v3747_v19  ;;  %v3763_v12 = vsub.f32 %v5478_v21, %v218_v9  ;;  %v3767_v15 = vsub.f32 %v5480_v24, %v218_v9  ;;  %v373_v38 = vadd.f32 %v372_v20, %v307_v3 }
  0xa9   :  { %v3773_v16 = vmul.f32 0.001953125, %v181_v26  ;;  %v5481_v21 = vunpack.c.l.bf16 %v3383_v36  ;;  %v5483_v31 = vunpack.c.h.bf16 %v3383_v36  ;;  %v5484_v6 = vunpack.c.l.bf16 %v3393_v40 }
  0xaa   :  { %5479 = vst [vmem:[#allocation8_spill] sm:$0xff] %v3763_v12  ;;  %v377_v44 = vadd.f32 %v310_v60, %v309_v39  ;;  %v374_v30 = vadd.f32 %v373_v38, %v308_v62  ;;  %v313_v3 = vmul.f32 %v3763_v12, %v3763_v12  ;;  %v314_v20 = vmul.f32 %v3767_v15, %v3767_v15  ;;  %v186_v39 = vpop.xlane.xlu0 %185 }
  0xab   :  { %v3777_v55 = vsub.f32 %v5481_v21, %v218_v9  ;;  %v3781_v10 = vsub.f32 %v5483_v31, %v218_v9  ;;  %v3789_v24 = vsub.f32 %v5484_v6, %v219_v13  ;;  %v5486_v9 = vunpack.c.h.bf16 %v3393_v40  ;;  %v191_v21 = vpop.xlane.xlu1 %190 }
  0xac   :  { %v378_v60 = vadd.f32 %v377_v44, %v311_v11  ;;  %v3799_v38 = vmul.f32 0.001953125, %v186_v39  ;;  %v382_v31 = vadd.f32 %v314_v20, %v313_v3  ;;  %v5487_v33 = vunpack.c.l.bf16 %v3407_v45  ;;  %375 = vadd.xlane.f32.xlu1 %v374_v30 }
  0xad   :  { %5482 = vst [vmem:[#allocation9_spill] sm:$0xff] %v3777_v55  ;;  %5485 = vst [vmem:[#allocation10_spill] sm:$0xff] %v3789_v24  ;;  %v315_v26 = vmul.f32 %v3777_v55, %v3777_v55  ;;  %v316_v36 = vmul.f32 %v3781_v10, %v3781_v10  ;;  %v3797_v62 = vsub.f32 %v5486_v9, %v219_v13  ;;  %v5489_v44 = vunpack.c.h.bf16 %v3407_v45 }
  0xae   :  { %v3803_v6 = vsub.f32 %v5487_v33, %v219_v13  ;;  %v379_v55 = vadd.f32 %v378_v60, %v312_v2  ;;  %v3809_v12 = vmul.f32 0.001953125, %v191_v21  ;;  %v317_v40 = vmul.f32 %v3789_v24, %v3789_v24  ;;  %v196_v2 = vpop.xlane.xlu0 %195 }
  0xaf   :  { %v3807_v11 = vsub.f32 %v5489_v44, %v219_v13  ;;  %v318_v39 = vmul.f32 %v3797_v62, %v3797_v62  ;;  %v383_v9 = vadd.f32 %v382_v31, %v315_v26  ;;  %v5491_v45 = vunpack.c.l.bf16 %v3412_v46 }
  0xb0   :  { %5488 = vst [vmem:[#allocation11_spill] sm:$0xff] %v3803_v6  ;;  %v319_v3 = vmul.f32 %v3803_v6, %v3803_v6  ;;  %380 = vadd.xlane.f32.xlu0 %v379_v55  ;;  %v5493_v20 = vunpack.c.h.bf16 %v3412_v46  ;;  %v5494_v21 = vunpack.c.l.bf16 %v3422_v51  ;;  %v5496_v31 = vunpack.c.h.bf16 %v3422_v51 }
  0xb1   :  { %5490 = vst [vmem:[#allocation12_spill] sm:$0xff] %v3807_v11  ;;  %v320_v33 = vmul.f32 %v3807_v11, %v3807_v11  ;;  %v3821_v13 = vsub.f32 %v5491_v45, %v220_v18  ;;  %v387_v30 = vadd.f32 %v318_v39, %v317_v40  ;;  %v3835_v6 = vmul.f32 0.001953125, %v196_v2  ;;  %v201_v45 = vpop.xlane.xlu1 %200 }
  0xb2   :  { %v3825_v60 = vsub.f32 %v5493_v20, %v220_v18  ;;  %v3829_v26 = vsub.f32 %v5494_v21, %v220_v18  ;;  %v3833_v44 = vsub.f32 %v5496_v31, %v220_v18  ;;  %v384_v24 = vadd.f32 %v383_v9, %v316_v36 }
  0xb3   :  { %5492 = vst [vmem:[#allocation13_spill] sm:$0xff] %v3821_v13  ;;  %v321_v55 = vmul.f32 %v3821_v13, %v3821_v13  ;;  %v5498_v40 = vunpack.c.l.bf16 %v3427_v52  ;;  %v388_v39 = vadd.f32 %v387_v30, %v319_v3  ;;  %v3843_v20 = vmul.f32 0.001953125, %v201_v45  ;;  %v3112_v45 = vld [vmem:[%s5382_s3 + $0x38] sm:$0xff]  }
  0xb4   :  { %5495 = vst [vmem:[#allocation14_spill] sm:$0xff] %v3829_v26  ;;  %5497 = vst [vmem:[#allocation15_spill] sm:$0xff] %v3833_v44  ;;  %v322_v21 = vmul.f32 %v3825_v60, %v3825_v60  ;;  %v323_v51 = vmul.f32 %v3829_v26, %v3829_v26  ;;  %385 = vadd.xlane.f32.xlu1 %v384_v24  ;;  %v324_v18 = vmul.f32 %v3833_v44, %v3833_v44  ;;  %v3113_v24 = vld [vmem:[%s5382_s3 + $0xb8] sm:$0xff]   ;;  %v3115_v26 = vld [vmem:[%s5382_s3 + $0xf0] sm:$0xff]  }
  0xb5   :  { %v3841_v46 = vsub.f32 %v5498_v40, %v221_v23  ;;  %v5500_v36 = vunpack.c.h.bf16 %v3427_v52  ;;  %v5502_v2 = vunpack.c.l.bf16 %v3438_v57  ;;  %v5504_v3 = vunpack.c.h.bf16 %v3438_v57  ;;  %v3114_v52 = vld [vmem:[%s5382_s3 + $0x70] sm:$0xff]   ;;  %2843 = vmatpush3.bf16.msra.mxu0 %v3112_v45  ;;  %2907 = vmatpush3.bf16.msra.mxu1 %v3113_v24 }
  0xb6   :  { %v389_v40 = vadd.f32 %v388_v39, %v320_v33  ;;  %v211_v39 = vpop.xlane.xlu1 %210  ;;  %2844 = vmatprep.subr.bf16.mxu0 %v3114_v52  ;;  %v5508_v45 = vunpack.c.h.bf16 %v3455_v63  ;;  %2908 = vmatprep.subr.bf16.mxu1 %v3115_v26  ;;  %v3116_v52 = vld [vmem:[%s5382_s3 + $0x30] sm:$0xff]  }
  0xb7   :  { %5499 = vst [vmem:[#allocation16_spill] sm:$0xff] %v3841_v46  ;;  %v3853_v9 = vsub.f32 %v5500_v36, %v221_v23  ;;  %v3857_v31 = vsub.f32 %v5502_v2, %v221_v23  ;;  %v3861_v30 = vsub.f32 %v5504_v3, %v221_v23  ;;  %v206_v36 = vpop.xlane.xlu0 %205  ;;  %v392_v2 = vadd.f32 %v322_v21, %v321_v55  ;;  %v3117_v26 = vld [vmem:[%s5382_s3 + $0xb0] sm:$0xff]  }
  0xb8   :  { %v325_v57 = vmul.f32 %v3841_v46, %v3841_v46  ;;  %v5505_v23 = vunpack.c.l.bf16 %v3443_v58  ;;  %v3882_v13 = vmul.f32 0.001953125, %v206_v36  ;;  %390 = vadd.xlane.f32.xlu0 %v389_v40  ;;  %v5506_v36 = vunpack.c.h.bf16 %v3443_v58 }
  0xb9   :  { %5501 = vst [vmem:[#allocation17_spill] sm:$0xff] %v3853_v9  ;;  %5503 = vst [vmem:[#allocation18_spill] sm:$0xff] %v3857_v31  ;;  %v326_v44 = vmul.f32 %v3853_v9, %v3853_v9  ;;  %v327_v33 = vmul.f32 %v3857_v31, %v3857_v31  ;;  %v328_v55 = vmul.f32 %v3861_v30, %v3861_v30  ;;  %v5507_v9 = vunpack.c.l.bf16 %v3455_v63 }
  0xba   :  { %v3877_v3 = vsub.f32 %v5505_v23, %v3773_v16  ;;  %v393_v21 = vadd.f32 %v392_v2, %v323_v51  ;;  %v3890_v23 = vmul.f32 0.001953125, %v211_v39  ;;  %v3895_v46 = vsub.f32 %v5506_v36, %v3773_v16  ;;  %2845 = vmatpush3.bf16.msra.mxu0 %v3116_v52  ;;  %2909 = vmatpush3.bf16.msra.mxu1 %v3117_v26 }
  0xbb   :  { %v3900_v11 = vsub.f32 %v5507_v9, %v3773_v16  ;;  %v397_v31 = vadd.f32 %v326_v44, %v325_v57  ;;  %v3905_v24 = vsub.f32 %v5508_v45, %v3773_v16  ;;  %v5509_v58 = vunpack.c.l.bf16 %v3467_v28 }
  0xbc   :  { %v329_v51 = vmul.f32 %v3877_v3, %v3877_v3  ;;  %v394_v2 = vadd.f32 %v393_v21, %v324_v18  ;;  %v330_v9 = vmul.f32 %v3895_v46, %v3895_v46  ;;  %v5511_v63 = vunpack.c.h.bf16 %v3467_v28 }
  0xbd   :  { %v3912_v40 = vsub.f32 %v5509_v58, %v3799_v38  ;;  %v331_v44 = vmul.f32 %v3900_v11, %v3900_v11  ;;  %v398_v18 = vadd.f32 %v397_v31, %v327_v33  ;;  %v332_v57 = vmul.f32 %v3905_v24, %v3905_v24 }
  0xbe   :  { %v3921_v16 = vsub.f32 %v5511_v63, %v3799_v38  ;;  %v5512_v39 = vunpack.c.l.bf16 %v3478_v41  ;;  %v5514_v28 = vunpack.c.h.bf16 %v3478_v41  ;;  %395 = vadd.xlane.f32.xlu1 %v394_v2  ;;  %v402_v45 = vadd.f32 %v330_v9, %v329_v51 }
  0xbf   :  { %5510 = vst [vmem:[#allocation19_spill] sm:$0xff] %v3912_v40  ;;  %v333_v58 = vmul.f32 %v3912_v40, %v3912_v40  ;;  %v5516_v33 = vunpack.c.l.bf16 %v3483_v42  ;;  %v399_v41 = vadd.f32 %v398_v18, %v328_v55  ;;  %v5517_v2 = vunpack.c.h.bf16 %v3483_v42 }
  0xc0   :  { %v3934_v21 = vsub.f32 %v5512_v39, %v3799_v38  ;;  %v3939_v36 = vsub.f32 %v5514_v28, %v3799_v38  ;;  %v334_v31 = vmul.f32 %v3921_v16, %v3921_v16  ;;  %v3118_v39 = vld [vmem:[%s5382_s3 + $0x68] sm:$0xff]   ;;  %v5518_v55 = vunpack.c.l.bf16 %v3504_v61 }
  0xc1   :  { %v3948_v63 = vsub.f32 %v5516_v33, %v3809_v12  ;;  %v3960_v9 = vsub.f32 %v5517_v2, %v3809_v12  ;;  %v3119_v28 = vld [vmem:[%s5382_s3 + $0xe8] sm:$0xff]   ;;  %v403_v33 = vadd.f32 %v402_v45, %v331_v44  ;;  %400 = vadd.xlane.f32.xlu0 %v399_v41  ;;  %v5520_v44 = vunpack.c.l.bf16 %v3509_v22  ;;  %2846 = vmatprep.subr.bf16.mxu0 %v3118_v39 }
  0xc2   :  { %5513 = vst [vmem:[#allocation20_spill] sm:$0xff] %v3934_v21  ;;  %5515 = vst [vmem:[#allocation21_spill] sm:$0xff] %v3939_v36  ;;  %v335_v38 = vmul.f32 %v3934_v21, %v3934_v21  ;;  %v336_v51 = vmul.f32 %v3939_v36, %v3939_v36  ;;  %v407_v40 = vadd.f32 %v334_v31, %v333_v58  ;;  %v5519_v21 = vunpack.c.h.bf16 %v3504_v61  ;;  %v3120_v41 = vld [vmem:[%s5382_s3 + $0x28] sm:$0xff]  }
  0xc3   :  { %v3968_v18 = vsub.f32 %v5518_v55, %v3809_v12  ;;  %v337_v42 = vmul.f32 %v3948_v63, %v3948_v63  ;;  %v338_v52 = vmul.f32 %v3960_v9, %v3960_v9  ;;  %v3982_v45 = vsub.f32 %v5520_v44, %v3835_v6  ;;  %2910 = vmatprep.subr.bf16.mxu1 %v3119_v28  ;;  %v3121_v39 = vld [vmem:[%s5382_s3 + $0xa8] sm:$0xff]   ;;  %v3122_v28 = vld [vmem:[%s5382_s3 + $0x60] sm:$0xff]  }
  0xc4   :  { %v3973_v36 = vsub.f32 %v5519_v21, %v3809_v12  ;;  %v5521_v58 = vunpack.c.h.bf16 %v3509_v22  ;;  %v404_v61 = vadd.f32 %v403_v33, %v332_v57  ;;  %v408_v12 = vadd.f32 %v407_v40, %v335_v38  ;;  %2847 = vmatpush3.bf16.msra.mxu0 %v3120_v41  ;;  %2911 = vmatpush3.bf16.msra.mxu1 %v3121_v39 }
  0xc5   :  { %v339_v26 = vmul.f32 %v3968_v18, %v3968_v18  ;;  %v412_v2 = vadd.f32 %v338_v52, %v337_v42  ;;  %v5522_v55 = vunpack.c.l.bf16 %v3520_v59  ;;  %v5524_v40 = vunpack.c.h.bf16 %v3520_v59  ;;  %2848 = vmatprep.subr.bf16.mxu0 %v3122_v28 }
  0xc6   :  { %v3987_v31 = vsub.f32 %v5521_v58, %v3835_v6  ;;  %v340_v21 = vmul.f32 %v3973_v36, %v3973_v36  ;;  %v341_v38 = vmul.f32 %v3982_v45, %v3982_v45  ;;  %405 = vadd.xlane.f32.xlu1 %v404_v61  ;;  %v409_v33 = vadd.f32 %v408_v12, %v336_v51 }
  0xc7   :  { %v3999_v22 = vsub.f32 %v5522_v55, %v3835_v6  ;;  %v4004_v57 = vsub.f32 %v5524_v40, %v3835_v6  ;;  %v5525_v52 = vunpack.c.l.bf16 %v3533_v0  ;;  %v5527_v59 = vunpack.c.h.bf16 %v3533_v0 }
  0xc8   :  { %v342_v42 = vmul.f32 %v3987_v31, %v3987_v31  ;;  %v413_v58 = vadd.f32 %v412_v2, %v339_v26  ;;  %v5528_v12 = vunpack.c.l.bf16 %v3543_v17  ;;  %410 = vadd.xlane.f32.xlu0 %v409_v33  ;;  %v5530_v40 = vunpack.c.h.bf16 %v3543_v17 }
  0xc9   :  { %5523 = vst [vmem:[#allocation22_spill] sm:$0xff] %v3999_v22  ;;  %v4016_v44 = vsub.f32 %v5525_v52, %v3843_v20  ;;  %v4021_v6 = vsub.f32 %v5527_v59, %v3843_v20  ;;  %v343_v51 = vmul.f32 %v3999_v22, %v3999_v22  ;;  %v344_v61 = vmul.f32 %v4004_v57, %v4004_v57  ;;  %v3123_v59 = vld [vmem:[%s5382_s3 + $0xe0] sm:$0xff]  }
  0xca   :  { %v4033_v55 = vsub.f32 %v5528_v12, %v3843_v20  ;;  %v417_v0 = vadd.f32 %v342_v42, %v341_v38  ;;  %v4038_v52 = vsub.f32 %v5530_v40, %v3843_v20  ;;  %v414_v12 = vadd.f32 %v413_v58, %v340_v21  ;;  %2912 = vmatprep.subr.bf16.mxu1 %v3123_v59 }
  0xcb   :  { %5526 = vst [vmem:[#allocation23_spill] sm:$0xff] %v4016_v44  ;;  %v345_v26 = vmul.f32 %v4016_v44, %v4016_v44  ;;  %v346_v2 = vmul.f32 %v4021_v6, %v4021_v6  ;;  %v5531_v38 = vunpack.c.l.bf16 %v3556_v47  ;;  %v5533_v20 = vunpack.c.h.bf16 %v3556_v47  ;;  %v3125_v47 = vld [vmem:[%s5382_s3 + $0xa0] sm:$0xff]  }
  0xcc   :  { %5529 = vst [vmem:[#allocation24_spill] sm:$0xff] %v4033_v55  ;;  %v347_v41 = vmul.f32 %v4033_v55, %v4033_v55  ;;  %v418_v42 = vadd.f32 %v417_v0, %v343_v51  ;;  %v348_v40 = vmul.f32 %v4038_v52, %v4038_v52  ;;  %v5535_v21 = vunpack.c.l.bf16 %v3566_v27  ;;  %415 = vadd.xlane.f32.xlu1 %v414_v12  ;;  %v3126_v12 = vld [vmem:[%s5382_s3 + $0x58] sm:$0xff]  }
  0xcd   :  { %v4052_v17 = vsub.f32 %v5531_v38, %v3882_v13  ;;  %v4057_v33 = vsub.f32 %v5533_v20, %v3882_v13  ;;  %v422_v22 = vadd.f32 %v346_v2, %v345_v26  ;;  %v3124_v38 = vld [vmem:[%s5382_s3 + $0x20] sm:$0xff]   ;;  %v5537_v39 = vunpack.c.h.bf16 %v3566_v27  ;;  %v3127_v27 = vld [vmem:[%s5382_s3 + $0xd8] sm:$0xff]   ;;  %2913 = vmatpush3.bf16.msra.mxu1 %v3125_v47 }
  0xce   :  { %v4064_v58 = vsub.f32 %v5535_v21, %v3882_v13  ;;  %v5539_v26 = vunpack.c.l.bf16 %v3571_v54  ;;  %v5542_v55 = vunpack.c.l.bf16 %v3592_v29  ;;  %2849 = vmatpush3.bf16.msra.mxu0 %v3124_v38  ;;  %2914 = vmatprep.subr.bf16.mxu1 %v3127_v27  ;;  %v3133_v27 = vld [vmem:[%s5382_s3 + $0x90] sm:$0xff]  }
  0xcf   :  { %5532 = vst [vmem:[#allocation25_spill] sm:$0xff] %v4052_v17  ;;  %5534 = vst [vmem:[#allocation26_spill] sm:$0xff] %v4057_v33  ;;  %v4075_v51 = vsub.f32 %v5537_v39, %v3882_v13  ;;  %v349_v0 = vmul.f32 %v4052_v17, %v4052_v17  ;;  %v350_v28 = vmul.f32 %v4057_v33, %v4057_v33  ;;  %v5541_v39 = vunpack.c.h.bf16 %v3571_v54 }
  0xd0   :  { %5536 = vst [vmem:[#allocation27_spill] sm:$0xff] %v4064_v58  ;;  %v4084_v2 = vsub.f32 %v5539_v26, %v3890_v23  ;;  %v419_v13 = vadd.f32 %v418_v42, %v344_v61  ;;  %v423_v20 = vadd.f32 %v422_v22, %v347_v41  ;;  %v351_v21 = vmul.f32 %v4064_v58, %v4064_v58 }
  0xd1   :  { %5538 = vst [vmem:[#allocation28_spill] sm:$0xff] %v4075_v51  ;;  %v4097_v17 = vsub.f32 %v5541_v39, %v3890_v23  ;;  %v352_v26 = vmul.f32 %v4075_v51, %v4075_v51  ;;  %v427_v33 = vadd.f32 %v350_v28, %v349_v0  ;;  %v4104_v44 = vsub.f32 %v5542_v55, %v3890_v23  ;;  %v3131_v0 = vld [vmem:[%s5382_s3 + $0xd0] sm:$0xff]   ;;  %v3136_v39 = vld [vmem:[%s5382_s3 + $0x8] sm:$0xff]  }
  0xd2   :  { %5540 = vst [vmem:[#allocation29_spill] sm:$0xff] %v4084_v2  ;;  %v5544_v22 = vunpack.c.h.bf16 %v3592_v29  ;;  %420 = vadd.xlane.f32.xlu0 %v419_v13  ;;  %v424_v54 = vadd.f32 %v423_v20, %v348_v40  ;;  %v353_v59 = vmul.f32 %v4084_v2, %v4084_v2  ;;  %2850 = vmatprep.subr.bf16.mxu0 %v3126_v12  ;;  %v3128_v29 = vld [vmem:[%s5382_s3 + $0x18] sm:$0xff]   ;;  %v3132_v12 = vld [vmem:[%s5382_s3 + $0x10] sm:$0xff]   ;;  %v3134_v20 = vld [vmem:[%s5382_s3 + $0x48] sm:$0xff]  }
  0xd3   :  { %5543 = vst [vmem:[#allocation30_spill] sm:$0xff] %v4104_v44  ;;  %v354_v41 = vmul.f32 %v4097_v17, %v4097_v17  ;;  %v428_v42 = vadd.f32 %v427_v33, %v351_v21  ;;  %v355_v55 = vmul.f32 %v4104_v44, %v4104_v44  ;;  %2851 = vmatpush3.bf16.msra.mxu0 %v3128_v29  ;;  %v3130_v33 = vld [vmem:[%s5382_s3 + $0x50] sm:$0xff]   ;;  %v3135_v21 = vld [vmem:[%s5382_s3 + $0xc8] sm:$0xff]  }
  0xd4   :  { %v4109_v61 = vsub.f32 %v5544_v22, %v3890_v23  ;;  %v3129_v23 = vld [vmem:[%s5382_s3 + $0x98] sm:$0xff]   ;;  %425 = vadd.xlane.f32.xlu1 %v424_v54  ;;  %2852 = vmatprep.subr.bf16.mxu0 %v3130_v33  ;;  %v3138_v22 = vld [vmem:[%s5382_s3 + $0x40] sm:$0xff]   ;;  %v1300_v29 = vld [vmem:[%s5385_s6 + $0x10] sm:$0xff] }
  0xd5   :  { %v432_v38 = vadd.f32 %v354_v41, %v353_v59  ;;  %v429_v47 = vadd.f32 %v428_v42, %v352_v26  ;;  %2915 = vmatpush3.bf16.msra.mxu1 %v3129_v23  ;;  %v3137_v26 = vld [vmem:[%s5382_s3 + $0x88] sm:$0xff]   ;;  %v3139_v54 = vld [vmem:[%s5382_s3 + $0xc0] sm:$0xff]   ;;  %v3232_v42 = vmov 0   ;;  %v1301_v23 = vld [vmem:[%s5385_s6 + $0x18] sm:$0xff] }
  0xd6   :  { %5545 = vst [vmem:[#allocation31_spill] sm:$0xff] %v4109_v61  ;;  %v356_v40 = vmul.f32 %v4109_v61, %v4109_v61  ;;  %2916 = vmatprep.subr.bf16.mxu1 %v3131_v0  ;;  %v3140_v59 = vld [vmem:[%s5382_s3] sm:$0xff]   ;;  %3109 = vset.pattern.permute.xlu1 %v3232_v42  ;;  %v1305_v33 = vld [vmem:[%s5385_s6 + $0x38] sm:$0xff] }
  0xd7   :  { %v433_v28 = vadd.f32 %v432_v38, %v355_v55  ;;  %430 = vadd.xlane.f32.xlu0 %v429_v47  ;;  %2853 = vmatpush3.bf16.msra.mxu0 %v3132_v12  ;;  %v3141_v41 = vld [vmem:[%s5382_s3 + $0x80] sm:$0xff]   ;;  %v1299_v55 = vld [vmem:[%s5385_s6 + $0x8] sm:$0xff]  ;;  %v1304_v47 = vld [vmem:[%s5385_s6 + $0x30] sm:$0xff] }
  0xd8   :  { %2854 = vmatprep.subr.bf16.mxu0 %v3134_v20  ;;  %3108 = vset.pattern.permute.xlu0 %v3232_v42  ;;  %v1303_v38 = vld [vmem:[%s5385_s6 + $0x28] sm:$0xff]  ;;  %v1306_v0 = vld [vmem:[%s5385_s6 + $0x40] sm:$0xff] }
  0xd9   :  { %v434_v13 = vadd.f32 %v433_v28, %v356_v40  ;;  %2917 = vmatpush3.bf16.msra.mxu1 %v3133_v27  ;;  %v1302_v40 = vld [vmem:[%s5385_s6 + $0x20] sm:$0xff]  ;;  %v1308_v28 = vld [vmem:[%s5385_s6 + $0x50] sm:$0xff]  ;;  %v1315_v42 = vld [vmem:[%s5385_s6 + $0x88] sm:$0xff] }
  0xda   :  { %2918 = vmatprep.subr.bf16.mxu1 %v3135_v21  ;;  %v1310_v12 = vld [vmem:[%s5385_s6 + $0x60] sm:$0xff]  ;;  %v1307_v21 = vld [vmem:[%s5385_s6 + $0x48] sm:$0xff] }
  0xdb   :  { %435 = vadd.xlane.f32.xlu1 %v434_v13  ;;  %2855 = vmatpush3.bf16.msra.mxu0 %v3136_v39  ;;  %v1298_v27 = vld [vmem:[%s5385_s6] sm:$0xff]  ;;  %v1312_v13 = vld [vmem:[%s5385_s6 + $0x70] sm:$0xff]  ;;  %v1309_v39 = vld [vmem:[%s5385_s6 + $0x58] sm:$0xff] }
  0xdc   :  { %2856 = vmatprep.subr.bf16.mxu0 %v3138_v22  ;;  %v1314_v20 = vld [vmem:[%s5385_s6 + $0x80] sm:$0xff]  ;;  %v1311_v22 = vld [vmem:[%s5385_s6 + $0x68] sm:$0xff] }
  0xdd   :  { %2919 = vmatpush3.bf16.msra.mxu1 %v3137_v26  ;;  %v1316_v26 = vld [vmem:[%s5385_s6 + $0x90] sm:$0xff] }
  0xde   :  { %2920 = vmatprep.subr.bf16.mxu1 %v3139_v54  ;;  %v1318_v54 = vld [vmem:[%s5385_s6 + $0xa0] sm:$0xff] }
  0xdf   :  { %2857 = vmatpush3.bf16.msra.mxu0 %v3140_v59  ;;  %v1313_v59 = vld [vmem:[%s5385_s6 + $0x78] sm:$0xff] }
  0xe1   :  { %2921 = vmatpush3.bf16.msra.mxu1 %v3141_v41  ;;  %v1320_v41 = vld [vmem:[%s5385_s6 + $0xb0] sm:$0xff] }
  0xec   :  { %1369 = vperm.xlu1 %3109, %v1299_v55   ;;  %v1322_v55 = vld [vmem:[%s5385_s6 + $0xc0] sm:$0xff] }
  0xed   :  { %1364 = vperm.xlu0 %3108, %v1298_v27  }
  0xf0   :  { %1374 = vperm.xlu1 %3109, %v1300_v29   ;;  %v1317_v29 = vld [vmem:[%s5385_s6 + $0x98] sm:$0xff] }
  0xf1   :  { %1409 = vperm.xlu0 %3108, %v1307_v21  }
  0xf4   :  { %1379 = vperm.xlu1 %3109, %v1301_v23   ;;  %v1324_v23 = vld [vmem:[%s5385_s6 + $0xd0] sm:$0xff] }
  0xf5   :  { %1419 = vperm.xlu0 %3108, %v1309_v39   ;;  %v1327_v39 = vld [vmem:[%s5385_s6 + $0xe8] sm:$0xff] }
  0xf8   :  { %1384 = vperm.xlu1 %3109, %v1302_v40   ;;  %v1319_v40 = vld [vmem:[%s5385_s6 + $0xa8] sm:$0xff] }
  0xf9   :  { %1429 = vperm.xlu0 %3108, %v1311_v22   ;;  %v1334_v22 = vld [vmem:[%s5385_s6 + $0x120] sm:$0xff] }
  0xfc   :  { %1389 = vperm.xlu1 %3109, %v1303_v38   ;;  %v1326_v38 = vld [vmem:[%s5385_s6 + $0xe0] sm:$0xff] }
  0xfd   :  { %1439 = vperm.xlu0 %3108, %v1313_v59  }
 0x100   :  { %1394 = vperm.xlu1 %3109, %v1304_v47   ;;  %v1321_v47 = vld [vmem:[%s5385_s6 + $0xb8] sm:$0xff] }
 0x101   :  { %1449 = vperm.xlu0 %3108, %v1315_v42  }
 0x104   :  { %1399 = vperm.xlu1 %3109, %v1305_v33   ;;  %v1328_v33 = vld [vmem:[%s5385_s6 + $0xf0] sm:$0xff] }
 0x105   :  { %1459 = vperm.xlu0 %3108, %v1317_v29   ;;  %v1329_v29 = vld [vmem:[%s5385_s6 + $0xf8] sm:$0xff] }
 0x108   :  { %1404 = vperm.xlu1 %3109, %v1306_v0   ;;  %v1323_v0 = vld [vmem:[%s5385_s6 + $0xc8] sm:$0xff] }
 0x109   :  { %1469 = vperm.xlu0 %3108, %v1319_v40   ;;  %v1336_v40 = vld [vmem:[%s5385_s6 + $0x130] sm:$0xff] }
 0x10c   :  { %1414 = vperm.xlu1 %3109, %v1308_v28   ;;  %v1330_v28 = vld [vmem:[%s5385_s6 + $0x100] sm:$0xff] }
 0x10d   :  { %1479 = vperm.xlu0 %3108, %v1321_v47  }
 0x110   :  { %1424 = vperm.xlu1 %3109, %v1310_v12   ;;  %v1325_v12 = vld [vmem:[%s5385_s6 + $0xd8] sm:$0xff] }
 0x111   :  { %1489 = vperm.xlu0 %3108, %v1323_v0  }
 0x114   :  { %1434 = vperm.xlu1 %3109, %v1312_v13   ;;  %v1332_v13 = vld [vmem:[%s5385_s6 + $0x110] sm:$0xff] }
 0x115   :  { %1499 = vperm.xlu0 %3108, %v1325_v12  }
 0x118   :  { %1444 = vperm.xlu1 %3109, %v1314_v20  }
 0x119   :  { %1509 = vperm.xlu0 %3108, %v1327_v39  }
 0x11c   :  { %1454 = vperm.xlu1 %3109, %v1316_v26  }
 0x11d   :  { %1519 = vperm.xlu0 %3108, %v1329_v29   ;;  %v1340_v29 = vld [vmem:[%s5385_s6 + $0x150] sm:$0xff] }
 0x120   :  { %1464 = vperm.xlu1 %3109, %v1318_v54  }
 0x124   :  { %1474 = vperm.xlu1 %3109, %v1320_v41   ;;  %v551_v41 = vlaneseq }
 0x126   :  { %v552_v47 = vshrl.u32 %v551_v41, 7  ;;  %v635_v41 = vld [vmem:[%s5381_s2] sm:$0xf] }
 0x128   :  { %1484 = vperm.xlu1 %3109, %v1322_v55   ;;  %v4275_v39 = vsub.s32 0, %v552_v47 }
 0x12a   :  { %5546 = vst [vmem:[#allocation32_spill] sm:$0xff] %v4275_v39  ;;  %v4306_v44 = vrot.slane %v635_v41, %v4275_v39 }
 0x12b   :  { %v361_v27 = vpop.xlane.xlu0 %360 }
 0x12c   :  { %1494 = vperm.xlu1 %3109, %v1324_v23   ;;  %v437_v20 = vmul.f32 0.001953125, %v361_v27 }
 0x12e   :  { %v453_v21 = vadd.f32 1e-05, %v437_v20  ;;  %v557_v20 = vsub.s32 1, %v552_v47 }
 0x12f   :  { %v371_v26 = vpop.xlane.xlu0 %370 }
 0x130   :  { %1504 = vperm.xlu1 %3109, %v1326_v38   ;;  %3174 = vrsqrt.f32 %v453_v21  ;;  %v366_v54 = vpop.xlane.xlu1 %365  ;;  %v439_v59 = vmul.f32 0.001953125, %v371_v26  ;;  %v565_v21 = vsub.s32 3, %v552_v47 }
 0x131   :  { %v438_v42 = vmul.f32 0.001953125, %v366_v54  ;;  %v561_v54 = vsub.s32 2, %v552_v47 }
 0x132   :  { %v455_v55 = vadd.f32 1e-05, %v439_v59 }
 0x133   :  { %v454_v23 = vadd.f32 1e-05, %v438_v42  ;;  %v1333_v42 = vld [vmem:[%s5385_s6 + $0x118] sm:$0xff] }
 0x134   :  { %1514 = vperm.xlu1 %3109, %v1328_v33   ;;  %3176 = vrsqrt.f32 %v455_v55 }
 0x135   :  { %v376_v38 = vpop.xlane.xlu1 %375  ;;  %3178 = vrsqrt.f32 %v454_v23 }
 0x136   :  { %v440_v33 = vmul.f32 0.001953125, %v376_v38 }
 0x138   :  { %1524 = vperm.xlu1 %3109, %v1330_v28   ;;  %v1331_v28 = vld [vmem:[%s5385_s6 + $0x108] sm:$0xff]  ;;  %v456_v12 = vadd.f32 1e-05, %v440_v33 }
 0x139   :  { %v381_v0 = vpop.xlane.xlu0 %380  ;;  %1529 = vperm.xlu0 %3108, %v1331_v28  }
 0x13a   :  { %v441_v27 = vmul.f32 0.001953125, %v381_v0  ;;  %3180 = vrsqrt.f32 %v456_v12  ;;  %v4296_v12 = vrot.slane %v635_v41, %v557_v20 }
 0x13c   :  { %1534 = vperm.xlu1 %3109, %v1332_v13   ;;  %v1338_v13 = vld [vmem:[%s5385_s6 + $0x140] sm:$0xff]  ;;  %v457_v55 = vadd.f32 1e-05, %v441_v27 }
 0x13d   :  { %v386_v26 = vpop.xlane.xlu1 %385  ;;  %v3175_v0 = vpop.eup %3174  ;;  %1539 = vperm.xlu0 %3108, %v1333_v42  }
 0x13e   :  { %v442_v59 = vmul.f32 0.001953125, %v386_v26  ;;  %v486_v26 = vmul.f32 %v3175_v0, %v3651_v32  ;;  %v485_v58 = vmul.f32 %v3175_v0, %v3647_v34  ;;  %3182 = vrsqrt.f32 %v457_v55  ;;  %v1342_v32 = vld [vmem:[%s5385_s6 + $0x160] sm:$0xff] }
 0x140   :  { %1544 = vperm.xlu1 %3109, %v1334_v22   ;;  %v549_v22 = vld [vmem:[%s5380_s1] sm:$0xf]  ;;  %v458_v23 = vadd.f32 1e-05, %v442_v59  ;;  %v488_v59 = vmul.f32 %v3175_v0, %v3659_v35 }
 0x141   :  { %v4289_v38 = vrot.slane %v549_v22, %v557_v20  ;;  %v4291_v47 = vrot.slane %v549_v22, %v565_v21  ;;  %v4294_v33 = vrot.slane %v549_v22, %v4275_v39  ;;  %v4300_v27 = vrot.slane %v549_v22, %v561_v54  ;;  %v1335_v20 = vld [vmem:[%s5385_s6 + $0x128] sm:$0xff]  ;;  %v4320_v39 = vpop.eup %3176 }
 0x142   :  { %v487_v22 = vmul.f32 %v3175_v0, %v3655_v49  ;;  %3184 = vrsqrt.f32 %v458_v23  ;;  %1549 = vperm.xlu0 %3108, %v1335_v20  }
 0x143   :  { %v572_v35 = vmul.f32 %v4289_v38, %v486_v26  ;;  %v574_v42 = vmul.f32 %v4291_v47, %v488_v59 }
 0x144   :  { %1554 = vperm.xlu1 %3109, %v1336_v40   ;;  %v391_v40 = vpop.xlane.xlu0 %390  ;;  %v573_v49 = vmul.f32 %v4300_v27, %v487_v22 }
 0x145   :  { %v443_v28 = vmul.f32 0.001953125, %v391_v40  ;;  %v4312_v40 = vrot.slane %v635_v41, %v561_v54  ;;  %v3179_v54 = vpop.eup %3178 }
 0x146   :  { %v492_v20 = vmul.f32 %v3179_v54, %v3707_v7  ;;  %v489_v22 = vmul.f32 %v3179_v54, %v3695_v53 }
 0x147   :  { %v396_v34 = vpop.xlane.xlu1 %395  ;;  %v3181_v53 = vpop.eup %3180 }
 0x148   :  { %1564 = vperm.xlu1 %3109, %v1338_v13   ;;  %v4298_v13 = vrot.slane %v635_v41, %v565_v21  ;;  %v459_v21 = vadd.f32 1e-05, %v443_v28  ;;  %v444_v55 = vmul.f32 0.001953125, %v396_v34  ;;  %v658_v41 = vadd.f32 %v4296_v12, %v572_v35  ;;  %v1344_v34 = vld [vmem:[%s5385_s6 + $0x170] sm:$0xff] }
 0x149   :  { %v494_v28 = vmul.f32 %v4320_v39, %v3667_v4  ;;  %v491_v4 = vmul.f32 %v3179_v54, %v3703_v56  ;;  %v575_v7 = vmul.f32 %v4294_v33, %v489_v22  ;;  %v496_v56 = vmul.f32 %v4320_v39, %v3675_v5 }
 0x14a   :  { %3186 = vrsqrt.f32 %v459_v21  ;;  %v660_v0 = vadd.f32 %v4298_v13, %v574_v42  ;;  %v460_v26 = vadd.f32 1e-05, %v444_v55  ;;  %v401_v59 = vpop.xlane.xlu0 %400  ;;  %v490_v21 = vmul.f32 %v3179_v54, %v3699_v43 }
 0x14b   :  { %v445_v35 = vmul.f32 0.001953125, %v401_v59  ;;  %v580_v42 = vmul.f32 %v4289_v38, %v494_v28  ;;  %v578_v43 = vmul.f32 %v4291_v47, %v492_v20  ;;  %v577_v61 = vmul.f32 %v4300_v27, %v491_v4 }
 0x14c   :  { %1574 = vperm.xlu1 %3109, %v1340_v29   ;;  %v571_v29 = vmul.f32 %v4294_v33, %v485_v58  ;;  %v1337_v58 = vld [vmem:[%s5385_s6 + $0x138] sm:$0xff]  ;;  %3188 = vrsqrt.f32 %v460_v26  ;;  %v661_v26 = vadd.f32 %v4306_v44, %v575_v7  ;;  %v498_v22 = vmul.f32 %v3181_v53, %v3723_v48 }
 0x14d   :  { %1559 = vperm.xlu0 %3108, %v1337_v58   ;;  %v461_v55 = vadd.f32 1e-05, %v445_v35  ;;  %v666_v59 = vadd.f32 %v4296_v12, %v580_v42  ;;  %v664_v58 = vadd.f32 %v4298_v13, %v578_v43  ;;  %v663_v5 = vadd.f32 %v4312_v40, %v577_v61  ;;  %v1341_v61 = vld [vmem:[%s5385_s6 + $0x158] sm:$0xff] }
 0x14e   :  { %v657_v23 = vadd.f32 %v4306_v44, %v571_v29  ;;  %v576_v29 = vmul.f32 %v4289_v38, %v490_v21  ;;  %v1346_v21 = vld [vmem:[%s5385_s6 + $0x180] sm:$0xff]  ;;  %v584_v7 = vmul.f32 %v4289_v38, %v498_v22  ;;  %v582_v51 = vmul.f32 %v4291_v47, %v496_v56 }
 0x14f   :  { %v406_v2 = vpop.xlane.xlu1 %405  ;;  %3190 = vrsqrt.f32 %v461_v55  ;;  %v724_v42 = vpack.c.bf16 %v664_v58, %v660_v0  ;;  %v1348_v0 = vld [vmem:[%s5385_s6 + $0x190] sm:$0xff] }
 0x150   :  { %1584 = vperm.xlu1 %3109, %v1342_v32   ;;  %v659_v32 = vadd.f32 %v4312_v40, %v573_v49  ;;  %v1339_v49 = vld [vmem:[%s5385_s6 + $0x148] sm:$0xff]  ;;  %v446_v54 = vmul.f32 0.001953125, %v406_v2  ;;  %v662_v28 = vadd.f32 %v4296_v12, %v576_v29  ;;  %v721_v29 = vpack.c.bf16 %v661_v26, %v657_v23  ;;  %v4370_v23 = vpop.eup %3182 }
 0x151   :  { %v411_v20 = vpop.xlane.xlu0 %410  ;;  %1569 = vperm.xlu0 %3108, %v1339_v49   ;;  %1145 = vmatprep.mubr.bf16.mxu1 %v724_v42  ;;  %v670_v56 = vadd.f32 %v4296_v12, %v584_v7  ;;  %v668_v49 = vadd.f32 %v4298_v13, %v582_v51  ;;  %v495_v26 = vmul.f32 %v4320_v39, %v3671_v1 }
 0x152   :  { %v462_v35 = vadd.f32 1e-05, %v446_v54  ;;  %v447_v2 = vmul.f32 0.001953125, %v411_v20  ;;  %v722_v4 = vpack.c.bf16 %v662_v28, %v658_v41  ;;  %v723_v43 = vpack.c.bf16 %v663_v5, %v659_v32  ;;  %v4375_v28 = vpop.eup %3184 }
 0x153   :  { %v493_v41 = vmul.f32 %v4320_v39, %v3663_v50  ;;  %v497_v54 = vmul.f32 %v3181_v53, %v3713_v14  ;;  %v726_v22 = vpack.c.bf16 %v670_v56, %v666_v59  ;;  %v499_v14 = vmul.f32 %v3181_v53, %v3727_v8  ;;  %v1350_v39 = vld [vmem:[%s5385_s6 + $0x1a0] sm:$0xff] }
 0x154   :  { %1594 = vperm.xlu1 %3109, %v1344_v34   ;;  %v500_v34 = vmul.f32 %v3181_v53, %v3731_v25  ;;  %3192 = vrsqrt.f32 %v462_v35  ;;  %v463_v48 = vadd.f32 1e-05, %v447_v2  ;;  %1048 = vmatprep.mubr.bf16.mxu0 %v722_v4  ;;  %v581_v1 = vmul.f32 %v4300_v27, %v495_v26 }
 0x155   :  { %v416_v55 = vpop.xlane.xlu1 %415  ;;  %1049 = vmatmul.mubr.bf16.vlgmr.msra.gmra.mxu0 %v721_v29  ;;  %1146 = vmatmul.mubr.bf16.vlgmr.msra.gmra.mxu1 %v723_v43  ;;  %v579_v58 = vmul.f32 %v4294_v33, %v493_v41  ;;  %v583_v51 = vmul.f32 %v4294_v33, %v497_v54  ;;  %v585_v53 = vmul.f32 %v4300_v27, %v499_v14  ;;  %v1352_v54 = vld [vmem:[%s5385_s6 + $0x1b0] sm:$0xff] }
 0x156   :  { %v586_v25 = vmul.f32 %v4291_v47, %v500_v34  ;;  %v448_v32 = vmul.f32 0.001953125, %v416_v55  ;;  %3194 = vrsqrt.f32 %v463_v48  ;;  %1579 = vperm.xlu0 %3108, %v1341_v61   ;;  %v1343_v34 = vld [vmem:[%s5385_s6 + $0x168] sm:$0xff]  ;;  %1056 = vmatprep.mubr.bf16.mxu0 %v726_v22  ;;  %v502_v42 = vmul.f32 %v4370_v23, %v3747_v19  ;;  %v1345_v19 = vld [vmem:[%s5385_s6 + $0x178] sm:$0xff] }
 0x157   :  { %v665_v4 = vadd.f32 %v4306_v44, %v579_v58  ;;  %v669_v8 = vadd.f32 %v4306_v44, %v583_v51  ;;  %v667_v7 = vadd.f32 %v4312_v40, %v581_v1  ;;  %v506_v61 = vmul.f32 %v4375_v28, %v3767_v15  ;;  %v5547_v51 = vld [vmem:[#allocation6_spill] sm:$0xff]  ;;  %v5549_v1 = vld [vmem:[#allocation7_spill] sm:$0xff] }
 0x158   :  { %1604 = vperm.xlu1 %3109, %v1346_v21   ;;  %v672_v50 = vadd.f32 %v4298_v13, %v586_v25  ;;  %v4381_v21 = vpop.eup %3186  ;;  %v464_v20 = vadd.f32 1e-05, %v448_v32  ;;  %v671_v25 = vadd.f32 %v4312_v40, %v585_v53  ;;  %v588_v41 = vmul.f32 %v4289_v38, %v502_v42 }
 0x159   :  { %v4400_v48 = vpop.eup %3188  ;;  %v725_v55 = vpack.c.bf16 %v669_v8, %v665_v4  ;;  %v592_v15 = vmul.f32 %v4289_v38, %v506_v61  ;;  %v5550_v61 = vld [vmem:[#allocation9_spill] sm:$0xff] }
 0x15a   :  { %v728_v2 = vpack.c.bf16 %v672_v50, %v668_v49  ;;  %3196 = vrsqrt.f32 %v464_v20  ;;  %1589 = vperm.xlu0 %3108, %v1343_v34   ;;  %v508_v49 = vmul.f32 %v4375_v28, %v3781_v10  ;;  %v674_v58 = vadd.f32 %v4296_v12, %v588_v41 }
 0x15b   :  { %v421_v5 = vpop.xlane.xlu0 %420  ;;  %v501_v10 = vmul.f32 %v4370_v23, %v5547_v51 }
 0x15c   :  { %1614 = vperm.xlu1 %3109, %v1348_v0   ;;  %v449_v35 = vmul.f32 0.001953125, %v421_v5  ;;  %1153 = vmatprep.mubr.bf16.mxu1 %v728_v2  ;;  %v504_v0 = vmul.f32 %v4370_v23, %v3755_v37  ;;  %v727_v37 = vpack.c.bf16 %v671_v25, %v667_v7  ;;  %v4417_v20 = vpop.eup %3190  ;;  %v678_v5 = vadd.f32 %v4296_v12, %v592_v15  ;;  %v5548_v2 = vld [vmem:[#allocation8_spill] sm:$0xff] }
 0x15d   :  { %v426_v59 = vpop.xlane.xlu1 %425  ;;  %1057 = vmatmul.mubr.bf16.gmra.mxu0 %v725_v55  ;;  %v594_v22 = vmul.f32 %v4291_v47, %v508_v49  ;;  %v505_v4 = vmul.f32 %v4375_v28, %v5548_v2  ;;  %v507_v55 = vmul.f32 %v4375_v28, %v5550_v61  ;;  %v514_v28 = vmul.f32 %v4400_v48, %v3825_v60 }
 0x15e   :  { %v465_v29 = vadd.f32 1e-05, %v449_v35  ;;  %v450_v43 = vmul.f32 0.001953125, %v426_v59  ;;  %v590_v26 = vmul.f32 %v4291_v47, %v504_v0  ;;  %1599 = vperm.xlu0 %3108, %v1345_v19   ;;  %1154 = vmatmul.mubr.bf16.gmra.mxu1 %v727_v37  ;;  %v1347_v59 = vld [vmem:[%s5385_s6 + $0x188] sm:$0xff]  ;;  %v730_v53 = vpack.c.bf16 %v678_v5, %v674_v58  ;;  %v5551_v37 = vld [vmem:[#allocation12_spill] sm:$0xff] }
 0x15f   :  { %v680_v42 = vadd.f32 %v4298_v13, %v594_v22  ;;  %v593_v49 = vmul.f32 %v4300_v27, %v507_v55  ;;  %v512_v58 = vmul.f32 %v4381_v21, %v5551_v37  ;;  %v600_v60 = vmul.f32 %v4289_v38, %v514_v28  ;;  %v1358_v37 = vld [vmem:[%s5385_s6 + $0x1e0] sm:$0xff] }
 0x160   :  { %1624 = vperm.xlu1 %3109, %v1350_v39   ;;  %3198 = vrsqrt.f32 %v465_v29  ;;  %v466_v32 = vadd.f32 1e-05, %v450_v43  ;;  %v431_v56 = vpop.xlane.xlu0 %430  ;;  %v676_v35 = vadd.f32 %v4298_v13, %v590_v26  ;;  %v503_v39 = vmul.f32 %v4370_v23, %v5549_v1  ;;  %v1354_v43 = vld [vmem:[%s5385_s6 + $0x1c0] sm:$0xff]  ;;  %1064 = vmatprep.mubr.bf16.mxu0 %v730_v53  ;;  %v5552_v26 = vld [vmem:[#allocation15_spill] sm:$0xff] }
 0x161   :  { %v451_v50 = vmul.f32 0.001953125, %v431_v56  ;;  %v587_v29 = vmul.f32 %v4294_v33, %v501_v10  ;;  %v4436_v7 = vpop.eup %3192  ;;  %v591_v23 = vmul.f32 %v4294_v33, %v505_v4  ;;  %v516_v5 = vmul.f32 %v4400_v48, %v5552_v26  ;;  %v5553_v10 = vld [vmem:[#allocation10_spill] sm:$0xff] }
 0x162   :  { %3200 = vrsqrt.f32 %v466_v32  ;;  %v589_v25 = vmul.f32 %v4300_v27, %v503_v39  ;;  %v732_v0 = vpack.c.bf16 %v680_v42, %v676_v35  ;;  %v510_v32 = vmul.f32 %v4381_v21, %v3797_v62  ;;  %1609 = vperm.xlu0 %3108, %v1347_v59   ;;  %v5554_v39 = vld [vmem:[#allocation13_spill] sm:$0xff] }
 0x163   :  { %v467_v14 = vadd.f32 1e-05, %v451_v50  ;;  %v673_v19 = vadd.f32 %v4306_v44, %v587_v29  ;;  %v4445_v56 = vpop.eup %3194  ;;  %v677_v15 = vadd.f32 %v4306_v44, %v591_v23  ;;  %v1349_v50 = vld [vmem:[%s5385_s6 + $0x198] sm:$0xff]  ;;  %v679_v51 = vadd.f32 %v4312_v40, %v593_v49  ;;  %v5555_v29 = vld [vmem:[#allocation11_spill] sm:$0xff] }
 0x164   :  { %v436_v34 = vpop.xlane.xlu1 %435  ;;  %1634 = vperm.xlu1 %3109, %v1352_v54   ;;  %v675_v54 = vadd.f32 %v4312_v40, %v589_v25  ;;  %1161 = vmatprep.mubr.bf16.mxu1 %v732_v0  ;;  %v596_v62 = vmul.f32 %v4289_v38, %v510_v32  ;;  %v598_v4 = vmul.f32 %v4291_v47, %v512_v58  ;;  %v1351_v23 = vld [vmem:[%s5385_s6 + $0x1a8] sm:$0xff]  ;;  %v5557_v49 = vld [vmem:[#allocation17_spill] sm:$0xff] }
 0x165   :  { %v452_v8 = vmul.f32 0.001953125, %v436_v34  ;;  %3202 = vrsqrt.f32 %v467_v14  ;;  %v729_v22 = vpack.c.bf16 %v677_v15, %v673_v19  ;;  %v509_v14 = vmul.f32 %v4381_v21, %v5553_v10  ;;  %v1356_v34 = vld [vmem:[%s5385_s6 + $0x1d0] sm:$0xff] }
 0x166   :  { %v682_v2 = vadd.f32 %v4296_v12, %v596_v62  ;;  %v602_v1 = vmul.f32 %v4291_v47, %v516_v5  ;;  %v513_v59 = vmul.f32 %v4400_v48, %v5554_v39  ;;  %1619 = vperm.xlu0 %3108, %v1349_v50   ;;  %v686_v53 = vadd.f32 %v4296_v12, %v600_v60 }
 0x167   :  { %v468_v41 = vadd.f32 1e-05, %v452_v8  ;;  %v4467_v35 = vpop.eup %3196  ;;  %1065 = vmatmul.mubr.bf16.gmra.mxu0 %v729_v22  ;;  %v731_v8 = vpack.c.bf16 %v679_v51, %v675_v54  ;;  %v595_v42 = vmul.f32 %v4294_v33, %v509_v14  ;;  %v684_v61 = vadd.f32 %v4298_v13, %v598_v4 }
 0x168   :  { %1644 = vperm.xlu1 %3109, %v1354_v43   ;;  %v511_v43 = vmul.f32 %v4381_v21, %v5555_v29  ;;  %v688_v55 = vadd.f32 %v4298_v13, %v602_v1  ;;  %v599_v25 = vmul.f32 %v4294_v33, %v513_v59  ;;  %v734_v32 = vpack.c.bf16 %v686_v53, %v682_v2 }
 0x169   :  { %3204 = vrsqrt.f32 %v468_v41  ;;  %v5556_v41 = vld [vmem:[#allocation14_spill] sm:$0xff]  ;;  %1162 = vmatmul.mubr.bf16.gmra.mxu1 %v731_v8  ;;  %v681_v21 = vadd.f32 %v4306_v44, %v595_v42  ;;  %v518_v54 = vmul.f32 %v4417_v20, %v5557_v49  ;;  %v520_v22 = vmul.f32 %v4417_v20, %v3861_v30  ;;  %v5560_v49 = vld [vmem:[#allocation21_spill] sm:$0xff] }
 0x16a   :  { %v515_v0 = vmul.f32 %v4400_v48, %v5556_v41  ;;  %v597_v15 = vmul.f32 %v4300_v27, %v511_v43  ;;  %v736_v28 = vpack.c.bf16 %v688_v55, %v684_v61  ;;  %v685_v50 = vadd.f32 %v4306_v44, %v599_v25  ;;  %1629 = vperm.xlu0 %3108, %v1351_v23   ;;  %v5559_v42 = vld [vmem:[#allocation18_spill] sm:$0xff] }
 0x16b   :  { %v522_v48 = vmul.f32 %v4436_v7, %v3895_v46  ;;  %1072 = vmatprep.mubr.bf16.mxu0 %v734_v32  ;;  %v604_v5 = vmul.f32 %v4289_v38, %v518_v54  ;;  %v524_v51 = vmul.f32 %v4436_v7, %v3905_v24  ;;  %v1353_v46 = vld [vmem:[%s5385_s6 + $0x1b8] sm:$0xff]  ;;  %v606_v30 = vmul.f32 %v4291_v47, %v520_v22 }
 0x16c   :  { %1654 = vperm.xlu1 %3109, %v1356_v34   ;;  %v601_v62 = vmul.f32 %v4300_v27, %v515_v0  ;;  %v683_v26 = vadd.f32 %v4312_v40, %v597_v15  ;;  %1169 = vmatprep.mubr.bf16.mxu1 %v736_v28  ;;  %v733_v60 = vpack.c.bf16 %v685_v50, %v681_v21  ;;  %v5558_v34 = vld [vmem:[#allocation16_spill] sm:$0xff]  ;;  %v1355_v50 = vld [vmem:[%s5385_s6 + $0x1c8] sm:$0xff] }
 0x16d   :  { %v4486_v19 = vpop.eup %3198  ;;  %v608_v14 = vmul.f32 %v4289_v38, %v522_v48  ;;  %v517_v2 = vmul.f32 %v4417_v20, %v5558_v34  ;;  %v690_v4 = vadd.f32 %v4296_v12, %v604_v5  ;;  %v610_v1 = vmul.f32 %v4291_v47, %v524_v51 }
 0x16e   :  { %v687_v10 = vadd.f32 %v4312_v40, %v601_v62  ;;  %v521_v24 = vmul.f32 %v4436_v7, %v3877_v3  ;;  %v519_v29 = vmul.f32 %v4417_v20, %v5559_v42  ;;  %1639 = vperm.xlu0 %3108, %v1353_v46   ;;  %v692_v43 = vadd.f32 %v4298_v13, %v606_v30 }
 0x16f   :  { %v4499_v58 = vpop.eup %3200  ;;  %v694_v8 = vadd.f32 %v4296_v12, %v608_v14  ;;  %v603_v53 = vmul.f32 %v4294_v33, %v517_v2  ;;  %1073 = vmatmul.mubr.bf16.gmra.mxu0 %v733_v60  ;;  %v696_v23 = vadd.f32 %v4298_v13, %v610_v1  ;;  %v523_v3 = vmul.f32 %v4436_v7, %v3900_v11  ;;  %v1360_v11 = vld [vmem:[%s5385_s6 + $0x1f0] sm:$0xff]  ;;  %v2227_v2 = vld [vmem:[%s5386_s7] sm:$0xff] }
 0x170   :  { %1664 = vperm.xlu1 %3109, %v1358_v37   ;;  %v735_v59 = vpack.c.bf16 %v687_v10, %v683_v26  ;;  %v607_v61 = vmul.f32 %v4294_v33, %v521_v24  ;;  %v605_v25 = vmul.f32 %v4300_v27, %v519_v29  ;;  %v526_v41 = vmul.f32 %v4445_v56, %v3921_v16  ;;  %v5561_v37 = vld [vmem:[#allocation19_spill] sm:$0xff]  ;;  %v5562_v14 = vld [vmem:[#allocation20_spill] sm:$0xff] }
 0x171   :  { %v738_v55 = vpack.c.bf16 %v694_v8, %v690_v4  ;;  %v740_v20 = vpack.c.bf16 %v696_v23, %v692_v43  ;;  %v609_v21 = vmul.f32 %v4300_v27, %v523_v3  ;;  %v530_v15 = vmul.f32 %v4467_v35, %v3960_v9  ;;  %v1357_v43 = vld [vmem:[%s5385_s6 + $0x1d8] sm:$0xff]  ;;  %v2229_v23 = vld [vmem:[%s5386_s7 + $0x10] sm:$0xff] }
 0x172   :  { %v4519_v39 = vpop.eup %3202  ;;  %1170 = vmatmul.mubr.bf16.gmra.mxu1 %v735_v59  ;;  %v693_v32 = vadd.f32 %v4306_v44, %v607_v61  ;;  %v689_v7 = vadd.f32 %v4306_v44, %v603_v53  ;;  %v612_v16 = vmul.f32 %v4289_v38, %v526_v41  ;;  %v528_v54 = vmul.f32 %v4445_v56, %v5560_v49 }
 0x173   :  { %1080 = vmatprep.mubr.bf16.mxu0 %v738_v55  ;;  %v532_v28 = vmul.f32 %v4467_v35, %v3973_v36  ;;  %1177 = vmatprep.mubr.bf16.mxu1 %v740_v20  ;;  %v691_v9 = vadd.f32 %v4312_v40, %v605_v25  ;;  %v695_v62 = vadd.f32 %v4312_v40, %v609_v21  ;;  %v5563_v20 = vld [vmem:[#allocation23_spill] sm:$0xff] }
 0x174   :  { %v616_v48 = vmul.f32 %v4289_v38, %v530_v15  ;;  %v525_v26 = vmul.f32 %v4445_v56, %v5561_v37  ;;  %v737_v5 = vpack.c.bf16 %v693_v32, %v689_v7  ;;  %v614_v22 = vmul.f32 %v4291_v47, %v528_v54  ;;  %1674 = vperm.xlu1 %3109, %v1360_v11   ;;  %v5564_v7 = vld [vmem:[#allocation22_spill] sm:$0xff] }
 0x175   :  { %v618_v51 = vmul.f32 %v4291_v47, %v532_v28  ;;  %v529_v36 = vmul.f32 %v4467_v35, %v3948_v63  ;;  %v698_v46 = vadd.f32 %v4296_v12, %v612_v16  ;;  %v527_v34 = vmul.f32 %v4445_v56, %v5562_v14  ;;  %1649 = vperm.xlu0 %3108, %v1355_v50  }
 0x176   :  { %v4533_v0 = vpop.eup %3204  ;;  %v702_v60 = vadd.f32 %v4296_v12, %v616_v48  ;;  %v611_v10 = vmul.f32 %v4294_v33, %v525_v26  ;;  %v700_v4 = vadd.f32 %v4298_v13, %v614_v22  ;;  %v531_v1 = vmul.f32 %v4467_v35, %v3968_v18  ;;  %v5566_v48 = vld [vmem:[#allocation26_spill] sm:$0xff] }
 0x177   :  { %v704_v30 = vadd.f32 %v4298_v13, %v618_v51  ;;  %v615_v63 = vmul.f32 %v4294_v33, %v529_v36  ;;  %1081 = vmatmul.mubr.bf16.gmra.mxu0 %v737_v5  ;;  %v739_v24 = vpack.c.bf16 %v695_v62, %v691_v9  ;;  %v613_v8 = vmul.f32 %v4300_v27, %v527_v34  ;;  %v5567_v36 = vld [vmem:[#allocation28_spill] sm:$0xff]  ;;  %v5568_v34 = vld [vmem:[#allocation31_spill] sm:$0xff] }
 0x178   :  { %v742_v59 = vpack.c.bf16 %v702_v60, %v698_v46  ;;  %v534_v56 = vmul.f32 %v4486_v19, %v3987_v31  ;;  %v617_v42 = vmul.f32 %v4300_v27, %v531_v1  ;;  %v538_v29 = vmul.f32 %v4499_v58, %v4021_v6  ;;  %2293 = vperm.xlu1 %3109, %v2227_v2   ;;  %v2231_v60 = vld [vmem:[%s5386_s7 + $0x20] sm:$0xff]  ;;  %v1359_v2 = vld [vmem:[%s5385_s6 + $0x1e8] sm:$0xff] }
 0x179   :  { %v744_v53 = vpack.c.bf16 %v704_v30, %v700_v4  ;;  %v701_v18 = vadd.f32 %v4306_v44, %v615_v63  ;;  %v536_v31 = vmul.f32 %v4486_v19, %v4004_v57  ;;  %v697_v6 = vadd.f32 %v4306_v44, %v611_v10  ;;  %1659 = vperm.xlu0 %3108, %v1357_v43   ;;  %v5569_v63 = vld [vmem:[#allocation29_spill] sm:$0xff] }
 0x17a   :  { %1178 = vmatmul.mubr.bf16.gmra.mxu1 %v739_v24  ;;  %1088 = vmatprep.mubr.bf16.mxu0 %v742_v59  ;;  %v620_v35 = vmul.f32 %v4289_v38, %v534_v56  ;;  %v699_v61 = vadd.f32 %v4312_v40, %v613_v8  ;;  %v624_v3 = vmul.f32 %v4289_v38, %v538_v29  ;;  %v5570_v8 = vld [vmem:[#allocation25_spill] sm:$0xff]  ;;  %v5571_v29 = vld [vmem:[#allocation30_spill] sm:$0xff] }
 0x17b   :  { %1185 = vmatprep.mubr.bf16.mxu1 %v744_v53  ;;  %v540_v55 = vmul.f32 %v4499_v58, %v4038_v52  ;;  %v703_v25 = vadd.f32 %v4312_v40, %v617_v42  ;;  %v622_v41 = vmul.f32 %v4291_v47, %v536_v31  ;;  %v533_v57 = vmul.f32 %v4486_v19, %v3982_v45  ;;  %v5565_v45 = vld [vmem:[#allocation24_spill] sm:$0xff] }
 0x17c   :  { %v537_v32 = vmul.f32 %v4499_v58, %v5563_v20  ;;  %v706_v21 = vadd.f32 %v4296_v12, %v620_v35  ;;  %v710_v15 = vadd.f32 %v4296_v12, %v624_v3  ;;  %v535_v52 = vmul.f32 %v4486_v19, %v5564_v7  ;;  %2303 = vperm.xlu1 %3109, %v2229_v23   ;;  %v5572_v23 = vld [vmem:[#allocation27_spill] sm:$0xff] }
 0x17d   :  { %v626_v11 = vmul.f32 %v4291_v47, %v540_v55  ;;  %v741_v16 = vpack.c.bf16 %v701_v18, %v697_v6  ;;  %v708_v49 = vadd.f32 %v4298_v13, %v622_v41  ;;  %v539_v28 = vmul.f32 %v4499_v58, %v5565_v45  ;;  %v2233_v18 = vld [vmem:[%s5386_s7 + $0x30] sm:$0xff]  ;;  %1669 = vperm.xlu0 %3108, %v1359_v2   ;;  %v2243_v45 = vld [vmem:[%s5386_s7 + $0x80] sm:$0xff]  ;;  %v2250_v2 = vld [vmem:[%s5386_s7 + $0xb8] sm:$0xff] }
 0x17e   :  { %v623_v54 = vmul.f32 %v4294_v33, %v537_v32  ;;  %v746_v50 = vpack.c.bf16 %v710_v15, %v706_v21  ;;  %v619_v62 = vmul.f32 %v4294_v33, %v533_v57  ;;  %v542_v37 = vmul.f32 %v4519_v39, %v5566_v48  ;;  %v2237_v21 = vld [vmem:[%s5386_s7 + $0x50] sm:$0xff]  ;;  %v2247_v48 = vld [vmem:[%s5386_s7 + $0xa0] sm:$0xff] }
 0x17f   :  { %v712_v9 = vadd.f32 %v4298_v13, %v626_v11  ;;  %1089 = vmatmul.mubr.bf16.gmra.mxu0 %v741_v16  ;;  %v743_v26 = vpack.c.bf16 %v703_v25, %v699_v61  ;;  %v625_v19 = vmul.f32 %v4300_v27, %v539_v28  ;;  %v546_v5 = vmul.f32 %v4533_v0, %v4097_v17  ;;  %v2232_v16 = vld [vmem:[%s5386_s7 + $0x28] sm:$0xff] }
 0x180   :  { %1096 = vmatprep.mubr.bf16.mxu0 %v746_v50  ;;  %v621_v51 = vmul.f32 %v4300_v27, %v535_v52  ;;  %v628_v58 = vmul.f32 %v4289_v38, %v542_v37  ;;  %v544_v46 = vmul.f32 %v4519_v39, %v5567_v36  ;;  %v709_v10 = vadd.f32 %v4306_v44, %v623_v54  ;;  %v4673_v52 = vpop.permute.xlu1 %1369  ;;  %v2234_v54 = vld [vmem:[%s5386_s7 + $0x38] sm:$0xff]  ;;  %v2236_v28 = vld [vmem:[%s5386_s7 + $0x48] sm:$0xff]  ;;  %v2253_v36 = vld [vmem:[%s5386_s7 + $0xd0] sm:$0xff] }
 0x181   :  { %v748_v22 = vpack.c.bf16 %v712_v9, %v708_v49  ;;  %v632_v14 = vmul.f32 %v4289_v38, %v546_v5  ;;  %v548_v17 = vmul.f32 %v4533_v0, %v5568_v34  ;;  %v705_v4 = vadd.f32 %v4306_v44, %v619_v62  ;;  %2313 = vperm.xlu1 %3109, %v2231_v60   ;;  %v2245_v9 = vld [vmem:[%s5386_s7 + $0x90] sm:$0xff]  ;;  %v2238_v62 = vld [vmem:[%s5386_s7 + $0x58] sm:$0xff] }
 0x182   :  { %1186 = vmatmul.mubr.bf16.gmra.mxu1 %v743_v26  ;;  %v630_v30 = vmul.f32 %v4291_v47, %v544_v46  ;;  %v545_v1 = vmul.f32 %v4533_v0, %v5569_v63  ;;  %v711_v24 = vadd.f32 %v4312_v40, %v625_v19  ;;  %v541_v56 = vmul.f32 %v4519_v39, %v5570_v8  ;;  %v2240_v26 = vld [vmem:[%s5386_s7 + $0x68] sm:$0xff]  ;;  %v2249_v19 = vld [vmem:[%s5386_s7 + $0xb0] sm:$0xff]  ;;  %v2242_v5 = vld [vmem:[%s5386_s7 + $0x78] sm:$0xff] }
 0x183   :  { %1193 = vmatprep.mubr.bf16.mxu1 %v748_v22  ;;  %v718_v59 = vadd.f32 %v4296_v12, %v632_v14  ;;  %v634_v38 = vmul.f32 %v4291_v47, %v548_v17  ;;  %v707_v53 = vadd.f32 %v4312_v40, %v621_v51  ;;  %v714_v42 = vadd.f32 %v4296_v12, %v628_v58  ;;  %v1361_v12 = vld [vmem:[%s5385_s6 + $0x1f8] sm:$0xff]  ;;  %v2251_v51 = vld [vmem:[%s5386_s7 + $0xc0] sm:$0xff]  ;;  %v2244_v58 = vld [vmem:[%s5386_s7 + $0x88] sm:$0xff] }
 0x184   :  { %v547_v43 = vmul.f32 %v4533_v0, %v5571_v29  ;;  %v745_v35 = vpack.c.bf16 %v709_v10, %v705_v4  ;;  %v631_v47 = vmul.f32 %v4294_v33, %v545_v1  ;;  %v543_v6 = vmul.f32 %v4519_v39, %v5572_v23  ;;  %v2235_v39 = vld [vmem:[%s5386_s7 + $0x40] sm:$0xff]  ;;  %1679 = vperm.xlu0 %3108, %v1361_v12   ;;  %v4684_v49 = vpop.permute.xlu1 %1374  ;;  %v2246_v60 = vld [vmem:[%s5386_s7 + $0x98] sm:$0xff]  ;;  %v2248_v14 = vld [vmem:[%s5386_s7 + $0xa8] sm:$0xff]  ;;  %v4777_v29 = vpop.permute.xlu0 %1364 }
 0x185   :  { %v720_v31 = vadd.f32 %v4298_v13, %v634_v38  ;;  %v750_v61 = vpack.c.bf16 %v718_v59, %v714_v42  ;;  %v716_v0 = vadd.f32 %v4298_v13, %v630_v30  ;;  %v747_v3 = vpack.c.bf16 %v711_v24, %v707_v53  ;;  %2323 = vperm.xlu1 %3109, %v2233_v18   ;;  %v2228_v13 = vld [vmem:[%s5386_s7 + $0x8] sm:$0xff]  ;;  %v2255_v10 = vld [vmem:[%s5386_s7 + $0xe0] sm:$0xff]  ;;  %v2257_v17 = vld [vmem:[%s5386_s7 + $0xf0] sm:$0xff] }
 0x186   :  { %v627_v55 = vmul.f32 %v4294_v33, %v541_v56  ;;  %v633_v25 = vmul.f32 %v4300_v27, %v547_v43  ;;  %v717_v57 = vadd.f32 %v4306_v44, %v631_v47  ;;  %v629_v20 = vmul.f32 %v4300_v27, %v543_v6  ;;  %v2230_v27 = vld [vmem:[%s5386_s7 + $0x18] sm:$0xff]  ;;  %v2259_v4 = vld [vmem:[%s5386_s7 + $0x100] sm:$0xff]  ;;  %v2252_v63 = vld [vmem:[%s5386_s7 + $0xc8] sm:$0xff] }
 0x187   :  { %1097 = vmatmul.mubr.bf16.gmra.mxu0 %v745_v35  ;;  %v752_v41 = vpack.c.bf16 %v720_v31, %v716_v0  ;;  %v2261_v1 = vld [vmem:[%s5386_s7 + $0x110] sm:$0xff]  ;;  %v2254_v24 = vld [vmem:[%s5386_s7 + $0xd8] sm:$0xff]  ;;  %v2263_v38 = vld [vmem:[%s5386_s7 + $0x120] sm:$0xff] }
 0x188   :  { %1104 = vmatprep.mubr.bf16.mxu0 %v750_v61  ;;  %v713_v33 = vadd.f32 %v4306_v44, %v627_v55  ;;  %v719_v32 = vadd.f32 %v4312_v40, %v633_v25  ;;  %2298 = vperm.xlu0 %3108, %v2228_v13   ;;  %v715_v11 = vadd.f32 %v4312_v40, %v629_v20  ;;  %v2239_v44 = vld [vmem:[%s5386_s7 + $0x60] sm:$0xff]  ;;  %v2241_v40 = vld [vmem:[%s5386_s7 + $0x70] sm:$0xff]  ;;  %v4695_v50 = vpop.permute.xlu1 %1379  ;;  %v2256_v8 = vld [vmem:[%s5386_s7 + $0xe8] sm:$0xff]  ;;  %v4787_v31 = vpop.permute.xlu0 %1409 }
 0x189   :  { %2333 = vperm.xlu1 %3109, %v2235_v39   ;;  %v2265_v56 = vld [vmem:[%s5386_s7 + $0x130] sm:$0xff]  ;;  %v2258_v42 = vld [vmem:[%s5386_s7 + $0xf8] sm:$0xff]  ;;  %v2267_v43 = vld [vmem:[%s5386_s7 + $0x140] sm:$0xff]  ;;  %5576 = vst [vmem:[#allocation9_spill] sm:$0xff] %v4787_v31 }
 0x18a   :  { %1194 = vmatmul.mubr.bf16.gmra.mxu1 %v747_v3  ;;  %v749_v15 = vpack.c.bf16 %v717_v57, %v713_v33  ;;  %v751_v7 = vpack.c.bf16 %v719_v32, %v715_v11  ;;  %v2260_v18 = vld [vmem:[%s5386_s7 + $0x108] sm:$0xff]  ;;  %v2269_v47 = vld [vmem:[%s5386_s7 + $0x150] sm:$0xff]  ;;  %v2262_v23 = vld [vmem:[%s5386_s7 + $0x118] sm:$0xff] }
 0x18b   :  { %1201 = vmatprep.mubr.bf16.mxu1 %v752_v41  ;;  %v2271_v6 = vld [vmem:[%s5386_s7 + $0x160] sm:$0xff]  ;;  %v2264_v61 = vld [vmem:[%s5386_s7 + $0x128] sm:$0xff]  ;;  %v2273_v3 = vld [vmem:[%s5386_s7 + $0x170] sm:$0xff] }
 0x18c   :  { %2308 = vperm.xlu0 %3108, %v2230_v27   ;;  %v4706_v37 = vpop.permute.xlu1 %1384  ;;  %v4803_v0 = vpop.permute.xlu0 %1419  ;;  %v2266_v55 = vld [vmem:[%s5386_s7 + $0x138] sm:$0xff]  ;;  %v2275_v39 = vld [vmem:[%s5386_s7 + $0x180] sm:$0xff]  ;;  %v2268_v57 = vld [vmem:[%s5386_s7 + $0x148] sm:$0xff] }
 0x18d   :  { %2343 = vperm.xlu1 %3109, %v2237_v21   ;;  %5578 = vst [vmem:[#allocation15_spill] sm:$0xff] %v4803_v0  ;;  %v2277_v20 = vld [vmem:[%s5386_s7 + $0x190] sm:$0xff]  ;;  %v2270_v33 = vld [vmem:[%s5386_s7 + $0x158] sm:$0xff]  ;;  %v2279_v21 = vld [vmem:[%s5386_s7 + $0x1a0] sm:$0xff] }
 0x18f   :  { %1105 = vmatmul.mubr.bf16.gmra.mxu0 %v749_v15  ;;  %v2272_v15 = vld [vmem:[%s5386_s7 + $0x168] sm:$0xff] }
 0x190   :  { %2318 = vperm.xlu0 %3108, %v2232_v16   ;;  %v4717_v22 = vpop.permute.xlu1 %1389  ;;  %v4813_v41 = vpop.permute.xlu0 %1429  ;;  %v2283_v16 = vld [vmem:[%s5386_s7 + $0x1c0] sm:$0xff] }
 0x191   :  { %2353 = vperm.xlu1 %3109, %v2239_v44   ;;  %5580 = vst [vmem:[#allocation13_spill] sm:$0xff] %v4813_v41  ;;  %v2274_v44 = vld [vmem:[%s5386_s7 + $0x178] sm:$0xff] }
 0x192   :  { %1202 = vmatmul.mubr.bf16.gmra.mxu1 %v751_v7  ;;  %v2281_v7 = vld [vmem:[%s5386_s7 + $0x1b0] sm:$0xff] }
 0x194   :  { %2328 = vperm.xlu0 %3108, %v2234_v54   ;;  %v4728_v46 = vpop.permute.xlu1 %1394  ;;  %v4829_v32 = vpop.permute.xlu0 %1439  ;;  %v2276_v54 = vld [vmem:[%s5386_s7 + $0x188] sm:$0xff] }
 0x195   :  { %2363 = vperm.xlu1 %3109, %v2241_v40   ;;  %5582 = vst [vmem:[#allocation14_spill] sm:$0xff] %v4829_v32 }
 0x198   :  { %2338 = vperm.xlu0 %3108, %v2236_v28   ;;  %v4739_v34 = vpop.permute.xlu1 %1399  ;;  %v4839_v27 = vpop.permute.xlu0 %1449  ;;  %v2285_v28 = vld [vmem:[%s5386_s7 + $0x1d0] sm:$0xff] }
 0x199   :  { %2373 = vperm.xlu1 %3109, %v2243_v45   ;;  %5584 = vst [vmem:[#allocation16_spill] sm:$0xff] %v4839_v27 }
 0x19c   :  { %2348 = vperm.xlu0 %3108, %v2238_v62   ;;  %v4750_v30 = vpop.permute.xlu1 %1404  ;;  %v4855_v45 = vpop.permute.xlu0 %1459 }
 0x19d   :  { %2383 = vperm.xlu1 %3109, %v2245_v9   ;;  %5586 = vst [vmem:[#allocation21_spill] sm:$0xff] %v4855_v45  ;;  %v2278_v9 = vld [vmem:[%s5386_s7 + $0x198] sm:$0xff] }
 0x1a0   :  { %2358 = vperm.xlu0 %3108, %v2240_v26   ;;  %v4761_v59 = vpop.permute.xlu1 %1414  ;;  %v2287_v26 = vld [vmem:[%s5386_s7 + $0x1e0] sm:$0xff] }
 0x1a1   :  { %2393 = vperm.xlu1 %3109, %v2247_v48   ;;  %5573 = vst [vmem:[#allocation6_spill] sm:$0xff] %v4761_v59  ;;  %v4865_v48 = vpop.permute.xlu0 %1469 }
 0x1a2   :  { %5588 = vst [vmem:[#allocation20_spill] sm:$0xff] %v4865_v48 }
 0x1a4   :  { %2368 = vperm.xlu0 %3108, %v2242_v5   ;;  %v4772_v53 = vpop.permute.xlu1 %1424  ;;  %v2289_v5 = vld [vmem:[%s5386_s7 + $0x1f0] sm:$0xff] }
 0x1a5   :  { %2403 = vperm.xlu1 %3109, %v2249_v19   ;;  %5574 = vst [vmem:[#allocation8_spill] sm:$0xff] %v4772_v53  ;;  %v2280_v19 = vld [vmem:[%s5386_s7 + $0x1a8] sm:$0xff] }
 0x1a8   :  { %2378 = vperm.xlu0 %3108, %v2244_v58   ;;  %v4785_v35 = vpop.permute.xlu1 %1434  ;;  %v2282_v58 = vld [vmem:[%s5386_s7 + $0x1b8] sm:$0xff] }
 0x1a9   :  { %2413 = vperm.xlu1 %3109, %v2251_v51   ;;  %5575 = vst [vmem:[#allocation7_spill] sm:$0xff] %v4785_v35 }
 0x1ac   :  { %2388 = vperm.xlu0 %3108, %v2246_v60   ;;  %v4798_v12 = vpop.permute.xlu1 %1444  ;;  %v2744_v60 = vld [vmem:[#allocation2] sm:$0x1] }
 0x1ad   :  { %2423 = vperm.xlu1 %3109, %v2253_v36   ;;  %5577 = vst [vmem:[#allocation12_spill] sm:$0xff] %v4798_v12  ;;  %v4881_v36 = vpop.permute.xlu0 %1479 }
 0x1ae   :  { %5590 = vst [vmem:[#allocation22_spill] sm:$0xff] %v4881_v36 }
 0x1b0   :  { %2398 = vperm.xlu0 %3108, %v2248_v14   ;;  %v4811_v25 = vpop.permute.xlu1 %1454 }
 0x1b1   :  { %2433 = vperm.xlu1 %3109, %v2255_v10   ;;  %5579 = vst [vmem:[#allocation10_spill] sm:$0xff] %v4811_v25  ;;  %v2284_v10 = vld [vmem:[%s5386_s7 + $0x1c8] sm:$0xff] }
 0x1b4   :  { %2408 = vperm.xlu0 %3108, %v2250_v2   ;;  %v4824_v13 = vpop.permute.xlu1 %1464  ;;  %v2286_v2 = vld [vmem:[%s5386_s7 + $0x1d8] sm:$0xff] }
 0x1b5   :  { %2443 = vperm.xlu1 %3109, %v2257_v17   ;;  %5581 = vst [vmem:[#allocation11_spill] sm:$0xff] %v4824_v13  ;;  %v4888_v17 = vpop.permute.xlu0 %1489 }
 0x1b6   :  { %5592 = vst [vmem:[#allocation26_spill] sm:$0xff] %v4888_v17 }
 0x1b8   :  { %2418 = vperm.xlu0 %3108, %v2252_v63   ;;  %v4837_v11 = vpop.permute.xlu1 %1474 }
 0x1b9   :  { %2453 = vperm.xlu1 %3109, %v2259_v4   ;;  %5583 = vst [vmem:[#allocation17_spill] sm:$0xff] %v4837_v11  ;;  %v2288_v4 = vld [vmem:[%s5386_s7 + $0x1e8] sm:$0xff]  ;;  %v4896_v63 = vpop.permute.xlu0 %1499 }
 0x1ba   :  { %5593 = vst [vmem:[#allocation28_spill] sm:$0xff] %v4896_v63 }
 0x1bc   :  { %2428 = vperm.xlu0 %3108, %v2254_v24   ;;  %v4850_v40 = vpop.permute.xlu1 %1484 }
 0x1bd   :  { %2463 = vperm.xlu1 %3109, %v2261_v1   ;;  %5585 = vst [vmem:[#allocation18_spill] sm:$0xff] %v4850_v40  ;;  %v2290_v1 = vld [vmem:[%s5386_s7 + $0x1f8] sm:$0xff]  ;;  %v4901_v24 = vpop.permute.xlu0 %1509 }
 0x1be   :  { %5594 = vst [vmem:[#allocation31_spill] sm:$0xff] %v4901_v24 }
 0x1c0   :  { %2438 = vperm.xlu0 %3108, %v2256_v8   ;;  %v4863_v62 = vpop.permute.xlu1 %1494 }
 0x1c1   :  { %2473 = vperm.xlu1 %3109, %v2263_v38   ;;  %5587 = vst [vmem:[#allocation19_spill] sm:$0xff] %v4863_v62 }
 0x1c4   :  { %2448 = vperm.xlu0 %3108, %v2258_v42   ;;  %v4876_v51 = vpop.permute.xlu1 %1504 }
 0x1c5   :  { %2483 = vperm.xlu1 %3109, %v2265_v56   ;;  %5589 = vst [vmem:[#allocation23_spill] sm:$0xff] %v4876_v51  ;;  %v4906_v56 = vld [vmem:[%s5383_s4] ss:$0 sm:$0xff] }
 0x1c8   :  { %2458 = vperm.xlu0 %3108, %v2260_v18   ;;  %v4886_v14 = vpop.permute.xlu1 %1514 }
 0x1c9   :  { %2493 = vperm.xlu1 %3109, %v2267_v43   ;;  %5591 = vst [vmem:[#allocation24_spill] sm:$0xff] %v4886_v14 }
 0x1cc   :  { %2468 = vperm.xlu0 %3108, %v2262_v23  }
 0x1cd   :  { %2503 = vperm.xlu1 %3109, %v2269_v47  }
 0x1d0   :  { %2478 = vperm.xlu0 %3108, %v2264_v61   ;;  %v3142_v61 = vld [vmem:[%s5384_s5] sm:$0xff]  }
 0x1d1   :  { %2513 = vperm.xlu1 %3109, %v2271_v6   ;;  %3026 = vmatprep.mubr.bf16.mxu0 %v3142_v61 }
 0x1d4   :  { %2488 = vperm.xlu0 %3108, %v2266_v55  }
 0x1d5   :  { %2523 = vperm.xlu1 %3109, %v2273_v3   ;;  %v3143_v3 = vld [vmem:[%s5384_s5 + $0x80] sm:$0xff]  }
 0x1d6   :  { %3058 = vmatprep.mubr.bf16.mxu1 %v3143_v3 }
 0x1d8   :  { %2498 = vperm.xlu0 %3108, %v2268_v57  }
 0x1d9   :  { %2533 = vperm.xlu1 %3109, %v2275_v39  }
 0x1dc   :  { %2508 = vperm.xlu0 %3108, %v2270_v33  }
 0x1dd   :  { %2543 = vperm.xlu1 %3109, %v2277_v20  }
 0x1e0   :  { %2518 = vperm.xlu0 %3108, %v2272_v15  }
 0x1e1   :  { %2553 = vperm.xlu1 %3109, %v2279_v21  }
 0x1e4   :  { %2528 = vperm.xlu0 %3108, %v2274_v44  }
 0x1e5   :  { %2563 = vperm.xlu1 %3109, %v2281_v7  }
 0x1e8   :  { %2538 = vperm.xlu0 %3108, %v2276_v54  }
 0x1e9   :  { %2573 = vperm.xlu1 %3109, %v2283_v16  }
 0x1ec   :  { %2548 = vperm.xlu0 %3108, %v2278_v9  }
 0x1ed   :  { %2583 = vperm.xlu1 %3109, %v2285_v28  }
 0x1f0   :  { %2558 = vperm.xlu0 %3108, %v2280_v19  }
 0x1f1   :  { %2593 = vperm.xlu1 %3109, %v2287_v26  }
 0x1f4   :  { %2568 = vperm.xlu0 %3108, %v2282_v58  }
 0x1f5   :  { %2603 = vperm.xlu1 %3109, %v2289_v5  }
 0x1f8   :  { %2578 = vperm.xlu0 %3108, %v2284_v10  }
 0x1f9   :  { %2747 = vperm.xlu1 %3109, %v2744_v60  }
 0x1fc   :  { %2588 = vperm.xlu0 %3108, %v2286_v2  }
 0x200   :  { %2598 = vperm.xlu0 %3108, %v2288_v4  }
 0x204   :  { %2608 = vperm.xlu0 %3108, %v2290_v1  }
 0x215   :  { %v2858_v38 = vpop.f32.mrf.mxu0  ;;  %v2922_v8 = vpop.f32.mrf.mxu1 }
 0x217   :  { %v2859_v42 = vpop.f32.mrf.mxu0  ;;  %v2923_v43 = vpop.f32.mrf.mxu1 }
 0x218   :  { %v2860_v18 = vadd.f32 %v2859_v42, %v2858_v38  ;;  %v2924_v47 = vadd.f32 %v2923_v43, %v2922_v8 }
 0x219   :  { %v2861_v23 = vpop.f32.mrf.mxu0  ;;  %v2925_v6 = vpop.f32.mrf.mxu1 }
 0x21a   :  { %v1051_v55 = vadd.f32 %v2860_v18, %v4906_v56 }
 0x21b   :  { %v2862_v39 = vpop.f32.mrf.mxu0  ;;  %v2926_v57 = vpop.f32.mrf.mxu1 }
 0x21c   :  { %v1148_v20 = vadd.f32 %v2924_v47, %v1051_v55  ;;  %v2863_v33 = vadd.f32 %v2862_v39, %v2861_v23  ;;  %v2927_v21 = vadd.f32 %v2926_v57, %v2925_v6 }
 0x21d   :  { %v2864_v15 = vpop.f32.mrf.mxu0 }
 0x21e   :  { %v1054_v7 = vadd.f32 %v2863_v33, %v4906_v56  ;;  %v2928_v44 = vpop.f32.mrf.mxu1  ;;  %v1210_v19 = vmax.f32 %v1148_v20, 0.0 }
 0x21f   :  { %v2865_v16 = vpop.f32.mrf.mxu0 }
 0x220   :  { %v1151_v54 = vadd.f32 %v2927_v21, %v1054_v7  ;;  %v2866_v28 = vadd.f32 %v2865_v16, %v2864_v15  ;;  %v2929_v9 = vpop.f32.mrf.mxu1 }
 0x221   :  { %v2867_v26 = vpop.f32.mrf.mxu0  ;;  %v2930_v60 = vadd.f32 %v2929_v9, %v2928_v44 }
 0x222   :  { %v1211_v5 = vmax.f32 %v1151_v54, 0.0  ;;  %v1059_v58 = vadd.f32 %v2866_v28, %v4906_v56  ;;  %v2931_v10 = vpop.f32.mrf.mxu1 }
 0x223   :  { %v2868_v2 = vpop.f32.mrf.mxu0 }
 0x224   :  { %v4917_v4 = vpack.c.bf16 %v1211_v5, %v1210_v19  ;;  %v1156_v1 = vadd.f32 %v2930_v60, %v1059_v58  ;;  %v2869_v38 = vadd.f32 %v2868_v2, %v2867_v26  ;;  %v2932_v8 = vpop.f32.mrf.mxu1 }
 0x225   :  { %v2933_v43 = vadd.f32 %v2932_v8, %v2931_v10 }
 0x226   :  { %v1062_v42 = vadd.f32 %v2869_v38, %v4906_v56  ;;  %v1212_v61 = vmax.f32 %v1156_v1, 0.0 }
 0x227   :  { %v2870_v18 = vpop.f32.mrf.mxu0 }
 0x228   :  { %v1159_v47 = vadd.f32 %v2933_v43, %v1062_v42 }
 0x229   :  { %v2934_v23 = vpop.f32.mrf.mxu1  ;;  %v2871_v6 = vpop.f32.mrf.mxu0 }
 0x22a   :  { %v1213_v3 = vmax.f32 %v1159_v47, 0.0  ;;  %v2872_v55 = vadd.f32 %v2871_v6, %v2870_v18 }
 0x22b   :  { %v2935_v39 = vpop.f32.mrf.mxu1  ;;  %v2873_v57 = vpop.f32.mrf.mxu0 }
 0x22c   :  { %v4920_v20 = vpack.c.bf16 %v1213_v3, %v1212_v61  ;;  %v1067_v33 = vadd.f32 %v2872_v55, %v4906_v56  ;;  %v2936_v21 = vadd.f32 %v2935_v39, %v2934_v23 }
 0x22d   :  { %v2937_v15 = vpop.f32.mrf.mxu1  ;;  %v2874_v7 = vpop.f32.mrf.mxu0 }
 0x22e   :  { %v1164_v44 = vadd.f32 %v2936_v21, %v1067_v33  ;;  %v2875_v16 = vadd.f32 %v2874_v7, %v2873_v57 }
 0x22f   :  { %v2938_v54 = vpop.f32.mrf.mxu1  ;;  %v2876_v28 = vpop.f32.mrf.mxu0 }
 0x230   :  { %v1070_v9 = vadd.f32 %v2875_v16, %v4906_v56  ;;  %v2939_v26 = vadd.f32 %v2938_v54, %v2937_v15  ;;  %v1214_v1 = vmax.f32 %v1164_v44, 0.0 }
 0x231   :  { %v2877_v5 = vpop.f32.mrf.mxu0 }
 0x232   :  { %v2940_v19 = vpop.f32.mrf.mxu1  ;;  %v1167_v58 = vadd.f32 %v2939_v26, %v1070_v9  ;;  %v2878_v60 = vadd.f32 %v2877_v5, %v2876_v28 }
 0x233   :  { %v4924_v2 = vpop.f32.mrf.mxu0 }
 0x234   :  { %v2941_v10 = vpop.f32.mrf.mxu1  ;;  %v1215_v38 = vmax.f32 %v1167_v58, 0.0  ;;  %v1075_v8 = vadd.f32 %v2878_v60, %v4906_v56 }
 0x235   :  { %v2942_v42 = vadd.f32 %v2941_v10, %v2940_v19  ;;  %v4929_v18 = vpop.f32.mrf.mxu0 }
 0x236   :  { %v4927_v43 = vpop.f32.mrf.mxu1  ;;  %v4931_v47 = vpack.c.bf16 %v1215_v38, %v1214_v1 }
 0x237   :  { %v4933_v23 = vadd.f32 %v2942_v42, %v1075_v8  ;;  %v4937_v61 = vpop.f32.mrf.mxu0 }
 0x238   :  { %v4935_v6 = vpop.f32.mrf.mxu1 }
 0x239   :  { %v4941_v55 = vpop.f32.mrf.mxu0 }
 0x23a   :  { %v4939_v3 = vpop.f32.mrf.mxu1 }
 0x23b   :  { %v2885_v57 = vpop.f32.mrf.mxu0 }
 0x23c   :  { %v4943_v39 = vpop.f32.mrf.mxu1 }
 0x23d   :  { %v2886_v21 = vpop.f32.mrf.mxu0 }
 0x23e   :  { %v4945_v33 = vpop.f32.mrf.mxu1 }
 0x23f   :  { %v2888_v7 = vpop.f32.mrf.mxu0 }
 0x240   :  { %v4947_v15 = vpop.f32.mrf.mxu1 }
 0x241   :  { %v2889_v16 = vpop.f32.mrf.mxu0 }
 0x242   :  { %v2952_v44 = vpop.f32.mrf.mxu1 }
 0x243   :  { %v2891_v28 = vpop.f32.mrf.mxu0 }
 0x244   :  { %v2953_v54 = vpop.f32.mrf.mxu1 }
 0x245   :  { %v2892_v26 = vpop.f32.mrf.mxu0 }
 0x246   :  { %v2955_v9 = vpop.f32.mrf.mxu1  ;;  %v2893_v41 = vadd.f32 %v2892_v26, %v2891_v28  ;;  %v2954_v28 = vadd.f32 %v2953_v54, %v2952_v44  ;;  %v3152_v44 = vld [vmem:[%s5384_s5 + $0x28] sm:$0xff]   ;;  %v3154_v54 = vld [vmem:[%s5384_s5 + $0x30] sm:$0xff]   ;;  %v3156_v26 = vld [vmem:[%s5384_s5 + $0x38] sm:$0xff]  }
 0x247   :  { %v2894_v5 = vpop.f32.mrf.mxu0 }
 0x248   :  { %v2956_v19 = vpop.f32.mrf.mxu1 }
 0x249   :  { %v2895_v60 = vpop.f32.mrf.mxu0 }
 0x24a   :  { %v2958_v58 = vpop.f32.mrf.mxu1  ;;  %v2896_v17 = vadd.f32 %v2895_v60, %v2894_v5  ;;  %v2890_v5 = vadd.f32 %v2889_v16, %v2888_v7  ;;  %v3153_v16 = vld [vmem:[%s5384_s5 + $0xa8] sm:$0xff]  }
 0x24b   :  { %v2897_v1 = vpop.f32.mrf.mxu0 }
 0x24c   :  { %v2959_v10 = vpop.f32.mrf.mxu1  ;;  %v1099_v27 = vadd.f32 %v2896_v17, %v4906_v56  ;;  %v1091_v17 = vadd.f32 %v2890_v5, %v4906_v56  ;;  %v3166_v5 = vld [vmem:[%s5384_s5 + $0x60] sm:$0xff]  }
 0x24d   :  { %v2898_v8 = vpop.f32.mrf.mxu0  ;;  %v2960_v35 = vadd.f32 %v2959_v10, %v2958_v58  ;;  %v3158_v58 = vld [vmem:[%s5384_s5 + $0x40] sm:$0xff]  }
 0x24e   :  { %v2961_v38 = vpop.f32.mrf.mxu1  ;;  %v2899_v14 = vadd.f32 %v2898_v8, %v2897_v1  ;;  %v3159_v10 = vld [vmem:[%s5384_s5 + $0xc0] sm:$0xff]  }
 0x24f   :  { %v2900_v24 = vpop.f32.mrf.mxu0  ;;  %v1196_v60 = vadd.f32 %v2960_v35, %v1099_v27  ;;  %v2884_v35 = vadd.f32 %v4941_v55, %v4937_v61 }
 0x250   :  { %v2962_v42 = vpop.f32.mrf.mxu1  ;;  %v1102_v48 = vadd.f32 %v2899_v14, %v4906_v56 }
 0x251   :  { %v2901_v63 = vpop.f32.mrf.mxu0  ;;  %v2963_v25 = vadd.f32 %v2962_v42, %v2961_v38  ;;  %v3160_v38 = vld [vmem:[%s5384_s5 + $0x48] sm:$0xff]  }
 0x252   :  { %v2964_v51 = vpop.f32.mrf.mxu1  ;;  %v2902_v62 = vadd.f32 %v2901_v63, %v2900_v24  ;;  %v3161_v42 = vld [vmem:[%s5384_s5 + $0xc8] sm:$0xff]  }
 0x253   :  { %v2903_v36 = vpop.f32.mrf.mxu0  ;;  %v1199_v8 = vadd.f32 %v2963_v25, %v1102_v48 }
 0x254   :  { %v2965_v40 = vpop.f32.mrf.mxu1  ;;  %v1107_v11 = vadd.f32 %v2902_v62, %v4906_v56  ;;  %v1094_v62 = vadd.f32 %v2893_v41, %v4906_v56  ;;  %v1188_v41 = vadd.f32 %v2954_v28, %v1091_v17  ;;  %v3168_v17 = vld [vmem:[%s5384_s5 + $0x68] sm:$0xff]  }
 0x255   :  { %v2904_v45 = vpop.f32.mrf.mxu0  ;;  %v2966_v12 = vadd.f32 %v2965_v40, %v2964_v51  ;;  %v1223_v31 = vmax.f32 %v1199_v8, 0.0  ;;  %v2957_v40 = vadd.f32 %v2956_v19, %v2955_v9  ;;  %v3155_v9 = vld [vmem:[%s5384_s5 + $0xb0] sm:$0xff]   ;;  %v3157_v19 = vld [vmem:[%s5384_s5 + $0xb8] sm:$0xff]  }
 0x256   :  { %v2967_v13 = vpop.f32.mrf.mxu1  ;;  %v2905_v32 = vadd.f32 %v2904_v45, %v2903_v36  ;;  %v1222_v45 = vmax.f32 %v1196_v60, 0.0  ;;  %v2887_v36 = vadd.f32 %v2886_v21, %v2885_v57  ;;  %v3163_v8 = vld [vmem:[%s5384_s5 + $0xd0] sm:$0xff]   ;;  %v3167_v60 = vld [vmem:[%s5384_s5 + $0xe0] sm:$0xff]  }
 0x257   :  { %v1204_v53 = vadd.f32 %v2966_v12, %v1107_v11  ;;  %v1191_v25 = vadd.f32 %v2957_v40, %v1094_v62  ;;  %v2948_v11 = vadd.f32 %v4943_v39, %v4939_v3  ;;  %v3151_v39 = vld [vmem:[%s5384_s5 + $0xa0] sm:$0xff]   ;;  %v5055_v62 = vpop.permute.xlu1 %1524  ;;  %v3169_v40 = vld [vmem:[%s5384_s5 + $0xe8] sm:$0xff]  }
 0x258   :  { %v2968_v1 = vpop.f32.mrf.mxu1  ;;  %v1110_v63 = vadd.f32 %v2905_v32, %v4906_v56  ;;  %v1232_v12 = vpack.c.bf16 %v1223_v31, %v1222_v45  ;;  %v1083_v32 = vadd.f32 %v2884_v35, %v4906_v56  ;;  %v2881_v31 = vadd.f32 %v4929_v18, %v4924_v2  ;;  %v3173_v35 = vld [vmem:[%s5384_s5 + $0xf8] sm:$0xff]  }
 0x259   :  { %v2969_v24 = vadd.f32 %v2968_v1, %v2967_v13  ;;  %v1224_v0 = vmax.f32 %v1204_v53, 0.0  ;;  %v1086_v53 = vadd.f32 %v2887_v36, %v4906_v56  ;;  %v1221_v13 = vmax.f32 %v1191_v25, 0.0  ;;  %v3162_v1 = vld [vmem:[%s5384_s5 + $0x50] sm:$0xff]  }
 0x25a   :  { %v1180_v61 = vadd.f32 %v2948_v11, %v1083_v32  ;;  %v1078_v55 = vadd.f32 %v2881_v31, %v4906_v56  ;;  %v1216_v18 = vmax.f32 %v4933_v23, 0.0  ;;  %v3144_v56 = vld [vmem:[%s5384_s5 + $0x8] sm:$0xff]   ;;  %v3149_v23 = vld [vmem:[%s5384_s5 + $0x98] sm:$0xff]   ;;  %v3171_v36 = vld [vmem:[%s5384_s5 + $0xf0] sm:$0xff]  }
 0x25b   :  { %v1207_v14 = vadd.f32 %v2969_v24, %v1110_v63  ;;  %v3164_v63 = vld [vmem:[%s5384_s5 + $0x58] sm:$0xff]   ;;  %v5071_v28 = vpop.permute.xlu1 %1534 }
 0x25c   :  { %v1218_v21 = vmax.f32 %v1180_v61, 0.0  ;;  %v3165_v24 = vld [vmem:[%s5384_s5 + $0xd8] sm:$0xff]  }
 0x25d   :  { %v1225_v59 = vmax.f32 %v1207_v14, 0.0  ;;  %v5053_v14 = vpop.permute.xlu0 %1519 }
 0x25f   :  { %v1233_v51 = vpack.c.bf16 %v1225_v59, %v1224_v0  ;;  %v2951_v59 = vadd.f32 %v4947_v15, %v4945_v33  ;;  %v1220_v0 = vmax.f32 %v1188_v41, 0.0  ;;  %v2945_v33 = vadd.f32 %v4935_v6, %v4927_v43  ;;  %v3145_v43 = vld [vmem:[%s5384_s5 + $0x88] sm:$0xff]   ;;  %v3150_v6 = vld [vmem:[%s5384_s5 + $0x20] sm:$0xff]   ;;  %v5081_v41 = vpop.permute.xlu1 %1544 }
 0x261   :  { %3010 = vmatprep.subr.bf16.mxu0 %v1233_v51  ;;  %3090 = vmatprep.subr.bf16.mxu1 %v1233_v51  ;;  %v1183_v27 = vadd.f32 %v2951_v59, %v1086_v53  ;;  %v1231_v48 = vpack.c.bf16 %v1221_v13, %v1220_v0  ;;  %v1175_v15 = vadd.f32 %v2945_v33, %v1078_v55  ;;  %v5063_v45 = vpop.permute.xlu0 %1529 }
 0x262   :  { %3011 = vmatpush3.bf16.xpose.msra.mxu0 %v1233_v51  ;;  %3098 = vmatpush3.bf16.xpose.msra.mxu1 %v1233_v51  ;;  %v3170_v51 = vld [vmem:[%s5384_s5 + $0x70] sm:$0xff]  }
 0x263   :  { %3012 = vmatprep.subr.bf16.mxu0 %v1232_v12  ;;  %3091 = vmatprep.subr.bf16.mxu1 %v1232_v12  ;;  %v1219_v57 = vmax.f32 %v1183_v27, 0.0  ;;  %v1217_v2 = vmax.f32 %v1175_v15, 0.0  ;;  %v5085_v13 = vpop.permute.xlu1 %1554 }
 0x265   :  { %v1230_v7 = vpack.c.bf16 %v1219_v57, %v1218_v21  ;;  %v1229_v3 = vpack.c.bf16 %v1217_v2, %v1216_v18  ;;  %v5073_v25 = vpop.permute.xlu0 %1539 }
 0x267   :  { %v5089_v59 = vpop.permute.xlu1 %1564 }
 0x269   :  { %v5083_v53 = vpop.permute.xlu0 %1549 }
 0x26a   :  { %3013 = vmatpush3.bf16.xpose.msra.mxu0 %v1232_v12  ;;  %3099 = vmatpush3.bf16.xpose.msra.mxu1 %v1232_v12  ;;  %v3172_v12 = vld [vmem:[%s5384_s5 + $0x78] sm:$0xff]  }
 0x26b   :  { %3014 = vmatprep.subr.bf16.mxu0 %v1231_v48  ;;  %3092 = vmatprep.subr.bf16.mxu1 %v1231_v48  ;;  %v5093_v31 = vpop.permute.xlu1 %1574 }
 0x26d   :  { %v5087_v32 = vpop.permute.xlu0 %1559 }
 0x26f   :  { %v5097_v27 = vpop.permute.xlu1 %1584 }
 0x270   :  { %5596 = vst [vmem:[#allocation25_spill] sm:$0xff] %v5097_v27 }
 0x271   :  { %v5091_v0 = vpop.permute.xlu0 %1569 }
 0x272   :  { %3015 = vmatpush3.bf16.xpose.msra.mxu0 %v1231_v48  ;;  %3100 = vmatpush3.bf16.xpose.msra.mxu1 %v1231_v48 }
 0x273   :  { %3016 = vmatprep.subr.bf16.mxu0 %v1230_v7  ;;  %3093 = vmatprep.subr.bf16.mxu1 %v1230_v7  ;;  %v5101_v61 = vpop.permute.xlu1 %1594 }
 0x274   :  { %5598 = vst [vmem:[#allocation27_spill] sm:$0xff] %v5101_v61 }
 0x275   :  { %v5095_v11 = vpop.permute.xlu0 %1579 }
 0x276   :  { %5595 = vst [vmem:[#allocation29_spill] sm:$0xff] %v5095_v11 }
 0x277   :  { %v5105_v57 = vpop.permute.xlu1 %1604 }
 0x278   :  { %5600 = vst [vmem:[#allocation34_spill] sm:$0xff] %v5105_v57 }
 0x279   :  { %v5099_v48 = vpop.permute.xlu0 %1589 }
 0x27a   :  { %3017 = vmatpush3.bf16.xpose.msra.mxu0 %v1230_v7  ;;  %3101 = vmatpush3.bf16.xpose.msra.mxu1 %v1230_v7  ;;  %5597 = vst [vmem:[#allocation30_spill] sm:$0xff] %v5099_v48 }
 0x27b   :  { %3018 = vmatprep.subr.bf16.mxu0 %v1229_v3  ;;  %3094 = vmatprep.subr.bf16.mxu1 %v1229_v3  ;;  %v5109_v21 = vpop.permute.xlu1 %1614 }
 0x27c   :  { %5602 = vst [vmem:[#allocation36_spill] sm:$0xff] %v5109_v21 }
 0x27d   :  { %v5103_v55 = vpop.permute.xlu0 %1599 }
 0x27e   :  { %5599 = vst [vmem:[#allocation33_spill] sm:$0xff] %v5103_v55 }
 0x27f   :  { %v5113_v7 = vpop.permute.xlu1 %1624 }
 0x280   :  { %5604 = vst [vmem:[#allocation38_spill] sm:$0xff] %v5113_v7 }
 0x281   :  { %v5107_v33 = vpop.permute.xlu0 %1609 }
 0x282   :  { %3019 = vmatpush3.bf16.xpose.msra.mxu0 %v1229_v3  ;;  %3102 = vmatpush3.bf16.xpose.msra.mxu1 %v1229_v3  ;;  %5601 = vst [vmem:[#allocation35_spill] sm:$0xff] %v5107_v33 }
 0x283   :  { %3020 = vmatprep.subr.bf16.mxu0 %v4931_v47  ;;  %3095 = vmatprep.subr.bf16.mxu1 %v4931_v47  ;;  %v5117_v18 = vpop.permute.xlu1 %1634 }
 0x284   :  { %5606 = vst [vmem:[#allocation40_spill] sm:$0xff] %v5117_v18 }
 0x285   :  { %v5111_v15 = vpop.permute.xlu0 %1619 }
 0x286   :  { %5603 = vst [vmem:[#allocation37_spill] sm:$0xff] %v5111_v15 }
 0x289   :  { %v5115_v2 = vpop.permute.xlu0 %1629 }
 0x28a   :  { %3021 = vmatpush3.bf16.xpose.msra.mxu0 %v4931_v47  ;;  %3103 = vmatpush3.bf16.xpose.msra.mxu1 %v4931_v47  ;;  %v3147_v47 = vld [vmem:[%s5384_s5 + $0x90] sm:$0xff]   ;;  %5605 = vst [vmem:[#allocation39_spill] sm:$0xff] %v5115_v2 }
 0x28b   :  { %3022 = vmatprep.subr.bf16.mxu0 %v4920_v20  ;;  %3096 = vmatprep.subr.bf16.mxu1 %v4920_v20 }
 0x28d   :  { %v5119_v3 = vpop.permute.xlu0 %1639 }
 0x28e   :  { %5607 = vst [vmem:[#allocation41_spill] sm:$0xff] %v5119_v3 }
 0x292   :  { %3023 = vmatpush3.bf16.xpose.msra.mxu0 %v4920_v20  ;;  %3104 = vmatpush3.bf16.xpose.msra.mxu1 %v4920_v20  ;;  %v3146_v20 = vld [vmem:[%s5384_s5 + $0x10] sm:$0xff]  }
 0x293   :  { %3024 = vmatprep.subr.bf16.mxu0 %v4917_v4  ;;  %3097 = vmatprep.subr.bf16.mxu1 %v4917_v4 }
 0x29a   :  { %3025 = vmatpush3.bf16.xpose.msra.mxu0 %v4917_v4  ;;  %3105 = vmatpush3.bf16.xpose.msra.mxu1 %v4917_v4  ;;  %v3148_v4 = vld [vmem:[%s5384_s5 + $0x18] sm:$0xff]   ;;  %s3233_s5 = smov [#allocation3]  }
 0x29b   :  { %s2768_s30 = sshll.u32 %s3233_s5, 4  ;;  %s2769_s30 = int_to_ptr.vmem [resolvable:$true] %s2768_s30 }
 0x29c   :  { %s3210_s10 = scalar_lea.vmem %s2769_s30, 16  ;;  %s3214_s11 = scalar_lea.vmem %s2769_s30, 32 }
 0x29d   :  { %p3211_p0 = scmp.ne.s32.totalorder %s2769_s30, %s3210_s10  ;;  %p3215_p1 = scmp.lt.s32.totalorder %s2769_s30, %s2769_s30 }
 0x29e   :  { %p3216_p2 = scmp.lt.s32.totalorder %s3214_s11, %s3210_s10 }
 0x2a0   :  { %p3217_p3 = por %p3216_p2, %p3215_p1 }
 0x2a1   :  { %3027 = vmatmul.mubr.bf16.vlgmr.msra.gmra.mxu0 %v3144_v56  ;;  %3059 = vmatmul.mubr.bf16.vlgmr.msra.gmra.mxu1 %v3145_v43  ;;  %v5121_v56 = vpop.permute.xlu1 %1644  ;;  %v5123_v43 = vpop.permute.xlu0 %1649 }
 0x2a2   :  { %3030 = vmatprep.mubr.bf16.mxu0 %v3146_v20  ;;  %3062 = vmatprep.mubr.bf16.mxu1 %v3147_v47  ;;  %5608 = vst [vmem:[#allocation42_spill] sm:$0xff] %v5121_v56  ;;  %5609 = vst [vmem:[#allocation43_spill] sm:$0xff] %v5123_v43  ;;  %p3218_p4 = pnand %p3217_p3, %p3211_p0 }
 0x2a5   :  { %v5125_v20 = vpop.permute.xlu1 %1654  ;;  %v5127_v47 = vpop.permute.xlu0 %1659 }
 0x2a6   :  { %5610 = vst [vmem:[#allocation44_spill] sm:$0xff] %v5125_v20  ;;  %5611 = vst [vmem:[#allocation45_spill] sm:$0xff] %v5127_v47 }
 0x2a9   :  { %3031 = vmatmul.mubr.bf16.gmra.mxu0 %v3148_v4  ;;  %3063 = vmatmul.mubr.bf16.gmra.mxu1 %v3149_v23  ;;  %v5129_v4 = vpop.permute.xlu1 %1664  ;;  %v5131_v23 = vpop.permute.xlu0 %1669 }
 0x2aa   :  { %3034 = vmatprep.mubr.bf16.mxu0 %v3150_v6  ;;  %3066 = vmatprep.mubr.bf16.mxu1 %v3151_v39  ;;  %5612 = vst [vmem:[#allocation46_spill] sm:$0xff] %v5129_v4  ;;  %5613 = vst [vmem:[#allocation47_spill] sm:$0xff] %v5131_v23 }
 0x2ad   :  { %v5133_v6 = vpop.permute.xlu1 %1674  ;;  %v5135_v39 = vpop.permute.xlu0 %1679 }
 0x2ae   :  { %5614 = vst [vmem:[#allocation48_spill] sm:$0xff] %v5133_v6  ;;  %5615 = vst [vmem:[#allocation49_spill] sm:$0xff] %v5135_v39 }
 0x2b1   :  { %3035 = vmatmul.mubr.bf16.gmra.mxu0 %v3152_v44  ;;  %3067 = vmatmul.mubr.bf16.gmra.mxu1 %v3153_v16  ;;  %v2294_v44 = vpop.permute.xlu1 %2293  ;;  %v2299_v16 = vpop.permute.xlu0 %2298 }
 0x2b2   :  { %3038 = vmatprep.mubr.bf16.mxu0 %v3154_v54  ;;  %3070 = vmatprep.mubr.bf16.mxu1 %v3155_v9 }
 0x2b5   :  { %v2304_v54 = vpop.permute.xlu1 %2303  ;;  %v2309_v9 = vpop.permute.xlu0 %2308 }
 0x2b9   :  { %3039 = vmatmul.mubr.bf16.gmra.mxu0 %v3156_v26  ;;  %3071 = vmatmul.mubr.bf16.gmra.mxu1 %v3157_v19  ;;  %v2314_v26 = vpop.permute.xlu1 %2313  ;;  %v2319_v19 = vpop.permute.xlu0 %2318 }
 0x2ba   :  { %3042 = vmatprep.mubr.bf16.mxu0 %v3158_v58  ;;  %3074 = vmatprep.mubr.bf16.mxu1 %v3159_v10 }
 0x2bd   :  { %v5137_v58 = vpop.permute.xlu1 %2323  ;;  %v5139_v10 = vpop.permute.xlu0 %2328 }
 0x2c1   :  { %3043 = vmatmul.mubr.bf16.gmra.mxu0 %v3160_v38  ;;  %3075 = vmatmul.mubr.bf16.gmra.mxu1 %v3161_v42  ;;  %v5141_v38 = vpop.permute.xlu1 %2333  ;;  %v5143_v42 = vpop.permute.xlu0 %2338 }
 0x2c2   :  { %3046 = vmatprep.mubr.bf16.mxu0 %v3162_v1  ;;  %3078 = vmatprep.mubr.bf16.mxu1 %v3163_v8 }
 0x2c5   :  { %v5145_v1 = vpop.permute.xlu1 %2343  ;;  %v5147_v8 = vpop.permute.xlu0 %2348 }
 0x2c9   :  { %3047 = vmatmul.mubr.bf16.gmra.mxu0 %v3164_v63  ;;  %3079 = vmatmul.mubr.bf16.gmra.mxu1 %v3165_v24  ;;  %v5149_v63 = vpop.permute.xlu1 %2353  ;;  %v5151_v24 = vpop.permute.xlu0 %2358 }
 0x2ca   :  { %3050 = vmatprep.mubr.bf16.mxu0 %v3166_v5  ;;  %3082 = vmatprep.mubr.bf16.mxu1 %v3167_v60 }
 0x2cd   :  { %v5153_v5 = vpop.permute.xlu1 %2363  ;;  %v5155_v60 = vpop.permute.xlu0 %2368 }
 0x2d1   :  { %3051 = vmatmul.mubr.bf16.gmra.mxu0 %v3168_v17  ;;  %3083 = vmatmul.mubr.bf16.gmra.mxu1 %v3169_v40  ;;  %v5157_v17 = vpop.permute.xlu1 %2373  ;;  %v5159_v40 = vpop.permute.xlu0 %2378 }
 0x2d2   :  { %3054 = vmatprep.mubr.bf16.mxu0 %v3170_v51  ;;  %3086 = vmatprep.mubr.bf16.mxu1 %v3171_v36 }
 0x2d5   :  { %v5167_v6 = vpop.permute.xlu0 %2388 }
 0x2d9   :  { %3055 = vmatmul.mubr.bf16.gmra.mxu0 %v3172_v12  ;;  %3087 = vmatmul.mubr.bf16.gmra.mxu1 %v3173_v35  ;;  %v5163_v12 = vpop.permute.xlu1 %2383  ;;  %v5177_v15 = vpop.permute.xlu0 %2398 }
 0x2dd   :  { %v5173_v56 = vpop.permute.xlu1 %2393 }
 0x2e1   :  { %v5182_v48 = vpop.permute.xlu1 %2403 }
 0x361   :  { %v3028_v51 = vpop.f32.mrf.mxu0  ;;  %v5161_v36 = vpop.f32.mrf.mxu1 }
 0x362   :  { %v1917_v47 = vadd.f32 %v3028_v51, %v4684_v49 }
 0x363   :  { %v1908_v35 = vpop.f32.mrf.mxu0  ;;  %v5165_v39 = vpop.f32.mrf.mxu1 }
 0x364   :  { %v1909_v23 = vadd.f32 %v1908_v35, %v4777_v29  ;;  %v2165_v21 = vmax.f32 %v1917_v47, 0.0 }
 0x365   :  { %v3029_v4 = vpop.f32.mrf.mxu0  ;;  %v5171_v20 = vpop.f32.mrf.mxu1 }
 0x366   :  { %v2163_v3 = vmax.f32 %v1909_v23, 0.0  ;;  %v1920_v18 = vadd.f32 %v3029_v4, %v4695_v50  ;;  %v2613_v23 = vmul.f32 %v2304_v54, %v2165_v21 }
 0x367   :  { %v1911_v43 = vpop.f32.mrf.mxu0  ;;  %v5179_v57 = vpop.f32.mrf.mxu1 }
 0x368   :  { %v1912_v2 = vadd.f32 %v1911_v43, %v4673_v52  ;;  %v2611_v35 = vmul.f32 %v2294_v44, %v2163_v3  ;;  %v2166_v49 = vmax.f32 %v1920_v18, 0.0 }
 0x369   :  { %v3032_v7 = vpop.f32.mrf.mxu0  ;;  %v5185_v43 = vpop.f32.mrf.mxu1 }
 0x36a   :  { %v2164_v33 = vmax.f32 %v1912_v2, 0.0  ;;  %v1933_v52 = vadd.f32 %v3032_v7, %v4728_v46  ;;  %v5187_v2 = vpop.permute.xlu0 %2408  ;;  %v2614_v27 = vmul.f32 %v2309_v9, %v2166_v49  ;;  %v5193_v7 = vpop.permute.xlu1 %2413 }
 0x36b   :  { %v1924_v29 = vpop.f32.mrf.mxu0  ;;  %v5191_v21 = vpop.f32.mrf.mxu1 }
 0x36c   :  { %v2612_v51 = vmul.f32 %v2299_v16, %v2164_v33  ;;  %v1925_v55 = vadd.f32 %v1924_v29, %v4706_v37  ;;  %v2169_v3 = vmax.f32 %v1933_v52, 0.0 }
 0x36d   :  { %v3033_v61 = vpop.f32.mrf.mxu0 }
 0x36e   :  { %v2675_v50 = vadd.f32 %v2612_v51, %v2611_v35  ;;  %v2167_v4 = vmax.f32 %v1925_v55, 0.0  ;;  %v1936_v18 = vadd.f32 %v3033_v61, %v4739_v34  ;;  %v5196_v51 = vpop.permute.xlu0 %2418  ;;  %v5199_v34 = vpop.f32.mrf.mxu1 }
 0x36f   :  { %v1927_v47 = vpop.f32.mrf.mxu0 }
 0x370   :  { %v2676_v11 = vadd.f32 %v2675_v50, %v2613_v23  ;;  %v1928_v33 = vadd.f32 %v1927_v47, %v4717_v22  ;;  %v2615_v44 = vmul.f32 %v2314_v26, %v2167_v4  ;;  %v2170_v29 = vmax.f32 %v1936_v18, 0.0  ;;  %v5617_v4 = vld [vmem:[#allocation15_spill] sm:$0xff] }
 0x371   :  { %v3036_v37 = vpop.f32.mrf.mxu0  ;;  %v2617_v22 = vmul.f32 %v5137_v58, %v2169_v3 }
 0x372   :  { %v2677_v16 = vadd.f32 %v2676_v11, %v2614_v27  ;;  %v2168_v54 = vmax.f32 %v1928_v33, 0.0  ;;  %v5616_v27 = vld [vmem:[#allocation6_spill] sm:$0xff]  ;;  %v2618_v50 = vmul.f32 %v5139_v10, %v2170_v29  ;;  %v5205_v33 = vpop.permute.xlu1 %2423  ;;  %v5619_v10 = vld [vmem:[#allocation8_spill] sm:$0xff] }
 0x373   :  { %v1940_v46 = vpop.f32.mrf.mxu0  ;;  %v1949_v26 = vadd.f32 %v3036_v37, %v5616_v27  ;;  %v5210_v37 = vpop.permute.xlu0 %2428 }
 0x374   :  { %v2678_v55 = vadd.f32 %v2677_v16, %v2615_v44  ;;  %v2616_v35 = vmul.f32 %v2319_v19, %v2168_v54  ;;  %v1941_v9 = vadd.f32 %v1940_v46, %v4750_v30  ;;  %v5618_v19 = vld [vmem:[#allocation9_spill] sm:$0xff]  ;;  %v5207_v44 = vpop.f32.mrf.mxu1 }
 0x375   :  { %v3037_v49 = vpop.f32.mrf.mxu0  ;;  %v2173_v16 = vmax.f32 %v1949_v26, 0.0 }
 0x376   :  { %v2679_v61 = vadd.f32 %v2678_v55, %v2616_v35  ;;  %v2171_v11 = vmax.f32 %v1941_v9, 0.0  ;;  %v1952_v47 = vadd.f32 %v3037_v49, %v5617_v4 }
 0x377   :  { %v1943_v23 = vpop.f32.mrf.mxu0 }
 0x378   :  { %v2680_v52 = vadd.f32 %v2679_v61, %v2617_v22  ;;  %v1944_v18 = vadd.f32 %v1943_v23, %v5618_v19  ;;  %v2619_v58 = vmul.f32 %v5141_v38, %v2171_v11  ;;  %v2174_v35 = vmax.f32 %v1952_v47, 0.0  ;;  %v5214_v22 = vpop.f32.mrf.mxu1  ;;  %v5620_v23 = vld [vmem:[#allocation7_spill] sm:$0xff]  ;;  %v5622_v47 = vld [vmem:[#allocation14_spill] sm:$0xff] }
 0x379   :  { %v3040_v30 = vpop.f32.mrf.mxu0  ;;  %v2621_v61 = vmul.f32 %v5145_v1, %v2173_v16 }
 0x37a   :  { %v2681_v3 = vadd.f32 %v2680_v52, %v2618_v50  ;;  %v2172_v54 = vmax.f32 %v1944_v18, 0.0  ;;  %v1965_v38 = vadd.f32 %v3040_v30, %v5620_v23  ;;  %v5218_v50 = vpop.permute.xlu1 %2433  ;;  %v5621_v52 = vld [vmem:[#allocation13_spill] sm:$0xff]  ;;  %v2622_v19 = vmul.f32 %v5147_v8, %v2174_v35 }
 0x37b   :  { %v1956_v46 = vpop.f32.mrf.mxu0 }
 0x37c   :  { %v2682_v55 = vadd.f32 %v2681_v3, %v2619_v58  ;;  %v1957_v29 = vadd.f32 %v1956_v46, %v5619_v10  ;;  %v2620_v9 = vmul.f32 %v5143_v42, %v2172_v54  ;;  %v5223_v3 = vpop.permute.xlu0 %2438  ;;  %v5225_v54 = vpop.f32.mrf.mxu1  ;;  %v2177_v16 = vmax.f32 %v1965_v38, 0.0 }
 0x37d   :  { %v3041_v49 = vpop.f32.mrf.mxu0 }
 0x37e   :  { %v2683_v27 = vadd.f32 %v2682_v55, %v2620_v9  ;;  %v2175_v11 = vmax.f32 %v1957_v29, 0.0  ;;  %v1968_v58 = vadd.f32 %v3041_v49, %v5622_v47  ;;  %v5623_v29 = vld [vmem:[#allocation12_spill] sm:$0xff]  ;;  %v5232_v49 = vpop.f32.mrf.mxu1 }
 0x37f   :  { %v1959_v26 = vpop.f32.mrf.mxu0 }
 0x380   :  { %v1960_v4 = vadd.f32 %v1959_v26, %v5621_v52  ;;  %v2684_v18 = vadd.f32 %v2683_v27, %v2621_v61  ;;  %v2623_v30 = vmul.f32 %v5149_v63, %v2175_v11  ;;  %v2178_v8 = vmax.f32 %v1968_v58, 0.0  ;;  %v5230_v61 = vpop.permute.xlu1 %2443  ;;  %v5624_v52 = vld [vmem:[#allocation10_spill] sm:$0xff]  ;;  %v5236_v11 = vpop.permute.xlu0 %2448  ;;  %v5626_v58 = vld [vmem:[#allocation21_spill] sm:$0xff] }
 0x381   :  { %v3044_v42 = vpop.f32.mrf.mxu0  ;;  %v2625_v27 = vmul.f32 %v5153_v5, %v2177_v16 }
 0x382   :  { %v2176_v1 = vmax.f32 %v1960_v4, 0.0  ;;  %v2685_v46 = vadd.f32 %v2684_v18, %v2622_v19  ;;  %v1981_v38 = vadd.f32 %v3044_v42, %v5624_v52  ;;  %v5625_v19 = vld [vmem:[#allocation16_spill] sm:$0xff]  ;;  %v2626_v18 = vmul.f32 %v5155_v60, %v2178_v8 }
 0x383   :  { %v1972_v55 = vpop.f32.mrf.mxu0 }
 0x384   :  { %v2624_v10 = vmul.f32 %v5151_v24, %v2176_v1  ;;  %v1973_v9 = vadd.f32 %v1972_v55, %v5623_v29  ;;  %v2686_v23 = vadd.f32 %v2685_v46, %v2623_v30  ;;  %v5241_v46 = vpop.f32.mrf.mxu1  ;;  %v2181_v29 = vmax.f32 %v1981_v38, 0.0 }
 0x385   :  { %v3045_v35 = vpop.f32.mrf.mxu0 }
 0x386   :  { %v2687_v26 = vadd.f32 %v2686_v23, %v2624_v10  ;;  %v2179_v4 = vmax.f32 %v1973_v9, 0.0  ;;  %v1984_v1 = vadd.f32 %v3045_v35, %v5626_v58  ;;  %v5244_v10 = vpop.permute.xlu1 %2453  ;;  %v5627_v23 = vld [vmem:[#allocation11_spill] sm:$0xff]  ;;  %v5250_v35 = vpop.f32.mrf.mxu1 }
 0x387   :  { %v1975_v63 = vpop.f32.mrf.mxu0  ;;  %5628 = vst [vmem:[#allocation6_spill] sm:$0xff] %v5250_v35 }
 0x388   :  { %v1976_v24 = vadd.f32 %v1975_v63, %v5625_v19  ;;  %v2688_v47 = vadd.f32 %v2687_v26, %v2625_v27  ;;  %v2627_v5 = vmul.f32 %v5157_v17, %v2179_v4  ;;  %v2182_v60 = vmax.f32 %v1984_v1, 0.0  ;;  %v5248_v27 = vpop.permute.xlu0 %2458  ;;  %v5629_v19 = vld [vmem:[#allocation17_spill] sm:$0xff] }
 0x389   :  { %v3048_v30 = vpop.f32.mrf.mxu0  ;;  %v2629_v26 = vmul.f32 %v5163_v12, %v2181_v29 }
 0x38a   :  { %v2180_v55 = vmax.f32 %v1976_v24, 0.0  ;;  %v2689_v16 = vadd.f32 %v2688_v47, %v2626_v18  ;;  %v1997_v17 = vadd.f32 %v3048_v30, %v5629_v19  ;;  %v5630_v18 = vld [vmem:[#allocation20_spill] sm:$0xff] }
 0x38b   :  { %v1988_v42 = vpop.f32.mrf.mxu0 }
 0x38c   :  { %v2628_v9 = vmul.f32 %v5159_v40, %v2180_v55  ;;  %v1989_v52 = vadd.f32 %v1988_v42, %v5627_v23  ;;  %v2690_v63 = vadd.f32 %v2689_v16, %v2627_v5  ;;  %v2630_v40 = vmul.f32 %v5167_v6, %v2182_v60  ;;  %v5631_v55 = vld [vmem:[#allocation22_spill] sm:$0xff]  ;;  %v5257_v16 = vpop.permute.xlu1 %2463  ;;  %v5259_v42 = vpop.f32.mrf.mxu1 }
 0x38d   :  { %v3049_v8 = vpop.f32.mrf.mxu0  ;;  %v2185_v35 = vmax.f32 %v1997_v17, 0.0 }
 0x38e   :  { %v2691_v38 = vadd.f32 %v2690_v63, %v2628_v9  ;;  %v2183_v4 = vmax.f32 %v1989_v52, 0.0  ;;  %v2000_v5 = vadd.f32 %v3049_v8, %v5631_v55  ;;  %v5262_v9 = vpop.permute.xlu0 %2468  ;;  %v5632_v63 = vld [vmem:[#allocation18_spill] sm:$0xff] }
 0x38f   :  { %v1991_v24 = vpop.f32.mrf.mxu0  ;;  %v2633_v19 = vmul.f32 %v5182_v48, %v2185_v35 }
 0x390   :  { %v1992_v47 = vadd.f32 %v1991_v24, %v5630_v18  ;;  %v2692_v58 = vadd.f32 %v2691_v38, %v2629_v26  ;;  %v2631_v12 = vmul.f32 %v5173_v56, %v2183_v4  ;;  %v2186_v26 = vmax.f32 %v2000_v5, 0.0  ;;  %v5266_v38 = vpop.f32.mrf.mxu1  ;;  %v5633_v18 = vld [vmem:[#allocation19_spill] sm:$0xff]  ;;  %v5270_v4 = vpop.permute.xlu1 %2473 }
 0x391   :  { %v3052_v1 = vpop.f32.mrf.mxu0 }
 0x392   :  { %v2184_v23 = vmax.f32 %v1992_v47, 0.0  ;;  %v2693_v29 = vadd.f32 %v2692_v58, %v2630_v40  ;;  %v2013_v17 = vadd.f32 %v3052_v1, %v5633_v18  ;;  %v5634_v40 = vld [vmem:[#allocation26_spill] sm:$0xff] }
 0x393   :  { %v2004_v30 = vpop.f32.mrf.mxu0 }
 0x394   :  { %v2632_v52 = vmul.f32 %v5177_v15, %v2184_v23  ;;  %v2005_v6 = vadd.f32 %v2004_v30, %v5632_v63  ;;  %v2694_v60 = vadd.f32 %v2693_v29, %v2631_v12  ;;  %v2634_v15 = vmul.f32 %v5187_v2, %v2186_v26  ;;  %v5635_v23 = vld [vmem:[#allocation28_spill] sm:$0xff]  ;;  %v5275_v29 = vpop.permute.xlu0 %2478  ;;  %v5277_v30 = vpop.f32.mrf.mxu1 }
 0x395   :  { %v3053_v8 = vpop.f32.mrf.mxu0  ;;  %v2189_v35 = vmax.f32 %v2013_v17, 0.0 }
 0x396   :  { %v2695_v24 = vadd.f32 %v2694_v60, %v2632_v52  ;;  %v2187_v47 = vmax.f32 %v2005_v6, 0.0  ;;  %v2016_v12 = vadd.f32 %v3053_v8, %v5635_v23  ;;  %v5636_v60 = vld [vmem:[#allocation23_spill] sm:$0xff]  ;;  %v5284_v8 = vpop.f32.mrf.mxu1 }
 0x397   :  { %v2007_v56 = vpop.f32.mrf.mxu0 }
 0x398   :  { %v2008_v58 = vadd.f32 %v2007_v56, %v5634_v40  ;;  %v2696_v55 = vadd.f32 %v2695_v24, %v2633_v19  ;;  %v2635_v1 = vmul.f32 %v5193_v7, %v2187_v47  ;;  %v2190_v2 = vmax.f32 %v2016_v12, 0.0  ;;  %v5282_v19 = vpop.permute.xlu1 %2483  ;;  %v5288_v47 = vpop.permute.xlu0 %2488 }
 0x399   :  { %v3056_v5 = vpop.f32.mrf.mxu0  ;;  %v2637_v24 = vmul.f32 %v5205_v33, %v2189_v35  ;;  %v2037_v33 = vadd.f32 %v5165_v39, %v5055_v62 }
 0x39a   :  { %v2188_v48 = vmax.f32 %v2008_v58, 0.0  ;;  %v2697_v52 = vadd.f32 %v2696_v55, %v2634_v15  ;;  %v5637_v58 = vld [vmem:[#allocation24_spill] sm:$0xff]  ;;  %v5638_v15 = vld [vmem:[#allocation31_spill] sm:$0xff]  ;;  %v2638_v55 = vmul.f32 %v5210_v37, %v2190_v2 }
 0x39b   :  { %v2020_v63 = vpop.f32.mrf.mxu0  ;;  %v2029_v17 = vadd.f32 %v3056_v5, %v5637_v58 }
 0x39c   :  { %v2636_v6 = vmul.f32 %v5196_v51, %v2188_v48  ;;  %v2021_v18 = vadd.f32 %v2020_v63, %v5636_v60  ;;  %v2698_v56 = vadd.f32 %v2697_v52, %v2635_v1  ;;  %v5293_v1 = vpop.f32.mrf.mxu1  ;;  %v2499_v2 = vpop.permute.xlu0 %2498 }
 0x39d   :  { %v3057_v26 = vpop.f32.mrf.mxu0  ;;  %v2193_v35 = vmax.f32 %v2029_v17, 0.0 }
 0x39e   :  { %v2699_v40 = vadd.f32 %v2698_v56, %v2636_v6  ;;  %v2191_v23 = vmax.f32 %v2021_v18, 0.0  ;;  %v2032_v12 = vadd.f32 %v3057_v26, %v5053_v14  ;;  %v2494_v6 = vpop.permute.xlu1 %2493  ;;  %v2040_v18 = vadd.f32 %v5179_v57, %v5063_v45  ;;  %v5301_v14 = vpop.f32.mrf.mxu1 }
 0x39f   :  { %v2023_v7 = vpop.f32.mrf.mxu0  ;;  %v2045_v26 = vadd.f32 %v5161_v36, %v5071_v28  ;;  %v2641_v62 = vmul.f32 %v5230_v61, %v2193_v35  ;;  %v2053_v28 = vadd.f32 %v5191_v21, %v5081_v41  ;;  %v2064_v21 = vadd.f32 %v5199_v34, %v5087_v32 }
 0x3a0   :  { %v2024_v51 = vadd.f32 %v2023_v7, %v5638_v15  ;;  %v2700_v48 = vadd.f32 %v2699_v40, %v2637_v24  ;;  %v2639_v5 = vmul.f32 %v5218_v50, %v2191_v23  ;;  %v2194_v56 = vmax.f32 %v2032_v12, 0.0  ;;  %v5309_v57 = vpop.f32.mrf.mxu1  ;;  %v2509_v7 = vpop.permute.xlu0 %2508 }
 0x3a1   :  { %v2195_v24 = vmax.f32 %v2037_v33, 0.0  ;;  %v2048_v50 = vadd.f32 %v5171_v20, %v5073_v25  ;;  %v2196_v40 = vmax.f32 %v2040_v18, 0.0  ;;  %v2197_v17 = vmax.f32 %v2045_v26, 0.0 }
 0x3a2   :  { %v2192_v52 = vmax.f32 %v2024_v51, 0.0  ;;  %v2701_v63 = vadd.f32 %v2700_v48, %v2638_v55  ;;  %v2504_v45 = vpop.permute.xlu1 %2503  ;;  %v2056_v25 = vadd.f32 %v5207_v44, %v5083_v53  ;;  %v2061_v55 = vadd.f32 %v5185_v43, %v5085_v13 }
 0x3a3   :  { %v2643_v23 = vmul.f32 %v5244_v10, %v2195_v24  ;;  %v2198_v61 = vmax.f32 %v2048_v50, 0.0  ;;  %v2644_v15 = vmul.f32 %v5248_v27, %v2196_v40  ;;  %v2645_v51 = vmul.f32 %v5257_v16, %v2197_v17 }
 0x3a4   :  { %v2640_v60 = vmul.f32 %v5223_v3, %v2192_v52  ;;  %v2702_v37 = vadd.f32 %v2701_v63, %v2639_v5  ;;  %v2642_v3 = vmul.f32 %v5236_v11, %v2194_v56  ;;  %v5317_v11 = vpop.f32.mrf.mxu1  ;;  %v2199_v10 = vmax.f32 %v2053_v28, 0.0  ;;  %v2519_v33 = vpop.permute.xlu0 %2518  ;;  %v5642_v28 = vld [vmem:[#allocation27_spill] sm:$0xff] }
 0x3a5   :  { %v2646_v41 = vmul.f32 %v5262_v9, %v2198_v61  ;;  %v2200_v27 = vmax.f32 %v2056_v25, 0.0  ;;  %v2201_v44 = vmax.f32 %v2061_v55, 0.0  ;;  %v2069_v16 = vadd.f32 %v5225_v54, %v5089_v59  ;;  %v5639_v54 = vld [vmem:[#allocation29_spill] sm:$0xff] }
 0x3a6   :  { %v2703_v39 = vadd.f32 %v2702_v37, %v2640_v60  ;;  %v2514_v12 = vpop.permute.xlu1 %2513  ;;  %v5325_v53 = vpop.f32.mrf.mxu1  ;;  %v2647_v35 = vmul.f32 %v5270_v4, %v2199_v10  ;;  %v2202_v43 = vmax.f32 %v2064_v21, 0.0  ;;  %v2072_v9 = vadd.f32 %v5241_v46, %v5091_v0 }
 0x3a7   :  { %v2648_v5 = vmul.f32 %v5275_v29, %v2200_v27  ;;  %v2649_v60 = vmul.f32 %v5282_v19, %v2201_v44  ;;  %v2077_v18 = vadd.f32 %v5214_v22, %v5093_v31  ;;  %v2203_v4 = vmax.f32 %v2069_v16, 0.0  ;;  %v5641_v22 = vld [vmem:[#allocation30_spill] sm:$0xff] }
 0x3a8   :  { %v2704_v58 = vadd.f32 %v2703_v39, %v2641_v62  ;;  %v5333_v34 = vpop.f32.mrf.mxu1  ;;  %v2529_v56 = vpop.permute.xlu0 %2528  ;;  %v2650_v59 = vmul.f32 %v5288_v47, %v2202_v43  ;;  %v2080_v29 = vadd.f32 %v5232_v49, %v5639_v54  ;;  %v2204_v26 = vmax.f32 %v2072_v9, 0.0  ;;  %v5640_v39 = vld [vmem:[#allocation25_spill] sm:$0xff] }
 0x3a9   :  { %v2205_v46 = vmax.f32 %v2077_v18, 0.0  ;;  %v2651_v62 = vmul.f32 %v2494_v6, %v2203_v4  ;;  %v2085_v50 = vadd.f32 %v5259_v42, %v5640_v39  ;;  %v5648_v18 = vld [vmem:[#allocation37_spill] sm:$0xff] }
 0x3aa   :  { %v2705_v36 = vadd.f32 %v2704_v58, %v2642_v3  ;;  %v2524_v32 = vpop.permute.xlu1 %2523  ;;  %v2119_v0 = vpop.f32.mrf.mxu1  ;;  %v2206_v3 = vmax.f32 %v2080_v29, 0.0  ;;  %v2652_v31 = vmul.f32 %v2499_v2, %v2204_v26  ;;  %v2088_v58 = vadd.f32 %v5277_v30, %v5641_v22 }
 0x3ab   :  { %v2653_v49 = vmul.f32 %v2504_v45, %v2205_v46 }
 0x3ac   :  { %v2706_v20 = vadd.f32 %v2705_v36, %v2643_v23  ;;  %v2539_v47 = vpop.permute.xlu0 %2538  ;;  %v5345_v23 = vpop.f32.mrf.mxu1  ;;  %v5643_v36 = vld [vmem:[#allocation6_spill] sm:$0xff]  ;;  %v2654_v25 = vmul.f32 %v2509_v7, %v2206_v3  ;;  %v5651_v3 = vld [vmem:[#allocation40_spill] sm:$0xff] }
 0x3ad   :  { %v2093_v61 = vadd.f32 %v5643_v36, %v5642_v28 }
 0x3ae   :  { %v2707_v48 = vadd.f32 %v2706_v20, %v2644_v15  ;;  %v2534_v40 = vpop.permute.xlu1 %2533  ;;  %v2207_v15 = vmax.f32 %v2085_v50, 0.0  ;;  %v5644_v20 = vld [vmem:[#allocation33_spill] sm:$0xff]  ;;  %v2132_v10 = vpop.f32.mrf.mxu1 }
 0x3af   :  { %v2096_v42 = vadd.f32 %v5266_v38, %v5644_v20  ;;  %v5647_v38 = vld [vmem:[#allocation36_spill] sm:$0xff] }
 0x3b0   :  { %v2708_v52 = vadd.f32 %v2707_v48, %v2645_v51  ;;  %v2208_v51 = vmax.f32 %v2088_v58, 0.0  ;;  %v2209_v48 = vmax.f32 %v2093_v61, 0.0  ;;  %v2655_v30 = vmul.f32 %v2514_v12, %v2207_v15  ;;  %v2549_v45 = vpop.permute.xlu0 %2548 }
 0x3b2   :  { %v2709_v13 = vadd.f32 %v2708_v52, %v2646_v41  ;;  %v2544_v2 = vpop.permute.xlu1 %2543  ;;  %v5645_v41 = vld [vmem:[#allocation34_spill] sm:$0xff]  ;;  %v2210_v52 = vmax.f32 %v2096_v42, 0.0  ;;  %v2656_v44 = vmul.f32 %v2519_v33, %v2208_v51  ;;  %v2657_v43 = vmul.f32 %v2524_v32, %v2209_v48  ;;  %v5654_v51 = vld [vmem:[#allocation43_spill] sm:$0xff] }
 0x3b3   :  { %v2101_v21 = vadd.f32 %v5293_v1, %v5645_v41  ;;  %v2112_v1 = vadd.f32 %v5301_v14, %v5648_v18  ;;  %v2125_v14 = vadd.f32 %v5317_v11, %v5651_v3  ;;  %v5655_v41 = vld [vmem:[#allocation44_spill] sm:$0xff] }
 0x3b4   :  { %v2710_v63 = vadd.f32 %v2709_v13, %v2647_v35  ;;  %v5646_v35 = vld [vmem:[#allocation35_spill] sm:$0xff]  ;;  %v3085_v13 = vpop.f32.mrf.mxu1  ;;  %v2658_v12 = vmul.f32 %v2529_v56, %v2210_v52  ;;  %v5656_v52 = vld [vmem:[#allocation45_spill] sm:$0xff] }
 0x3b5   :  { %v2104_v16 = vadd.f32 %v5309_v57, %v5646_v35  ;;  %v2211_v9 = vmax.f32 %v2101_v21, 0.0  ;;  %v5649_v57 = vld [vmem:[#allocation38_spill] sm:$0xff] }
 0x3b6   :  { %v2711_v37 = vadd.f32 %v2710_v63, %v2648_v5  ;;  %v2109_v5 = vadd.f32 %v5284_v8, %v5647_v38  ;;  %v2135_v33 = vpop.f32.mrf.mxu1  ;;  %v2117_v26 = vadd.f32 %v5325_v53, %v5649_v57  ;;  %v5650_v8 = vld [vmem:[#allocation39_spill] sm:$0xff] }
 0x3b7   :  { %v2212_v4 = vmax.f32 %v2104_v16, 0.0  ;;  %v2659_v29 = vmul.f32 %v2534_v40, %v2211_v9  ;;  %v5652_v40 = vld [vmem:[#allocation41_spill] sm:$0xff]  ;;  %v2136_v11 = vadd.f32 %v2135_v33, %v5654_v51 }
 0x3b8   :  { %v2712_v24 = vadd.f32 %v2711_v37, %v2649_v60  ;;  %v2554_v60 = vpop.permute.xlu1 %2553  ;;  %v2213_v54 = vmax.f32 %v2109_v5, 0.0  ;;  %v3088_v56 = vpop.f32.mrf.mxu1  ;;  %v5657_v5 = vld [vmem:[#allocation46_spill] sm:$0xff] }
 0x3b9   :  { %v2660_v46 = vmul.f32 %v2539_v47, %v2212_v4  ;;  %v2217_v47 = vmax.f32 %v2125_v14, 0.0  ;;  %v2220_v35 = vmax.f32 %v2136_v11, 0.0 }
 0x3ba   :  { %v2713_v19 = vadd.f32 %v2712_v24, %v2650_v59  ;;  %v2559_v59 = vpop.permute.xlu0 %2558  ;;  %v2214_v24 = vmax.f32 %v2112_v1, 0.0  ;;  %v2148_v36 = vpop.f32.mrf.mxu1  ;;  %v5658_v1 = vld [vmem:[#allocation47_spill] sm:$0xff] }
 0x3bb   :  { %v2149_v9 = vadd.f32 %v2148_v36, %v5657_v5 }
 0x3bc   :  { %v2714_v17 = vadd.f32 %v2713_v19, %v2651_v62  ;;  %v2120_v62 = vadd.f32 %v2119_v0, %v5650_v8  ;;  %v2564_v50 = vpop.permute.xlu1 %2563  ;;  %v2661_v19 = vmul.f32 %v2544_v2, %v2213_v54  ;;  %v5653_v0 = vld [vmem:[#allocation42_spill] sm:$0xff]  ;;  %v3089_v48 = vpop.f32.mrf.mxu1 }
 0x3bd   :  { %v2133_v15 = vadd.f32 %v2132_v10, %v5653_v0  ;;  %v2223_v54 = vmax.f32 %v2149_v9, 0.0 }
 0x3be   :  { %v2715_v6 = vadd.f32 %v2714_v17, %v2652_v31  ;;  %v2215_v31 = vmax.f32 %v2117_v26, 0.0  ;;  %v2569_v58 = vpop.permute.xlu0 %2568  ;;  %v2662_v17 = vmul.f32 %v2549_v45, %v2214_v24  ;;  %v2216_v53 = vmax.f32 %v2120_v62, 0.0  ;;  %v5660_v26 = vld [vmem:[#allocation49_spill] sm:$0xff] }
 0x3bf   :  { %v2219_v21 = vmax.f32 %v2133_v15, 0.0  ;;  %v5661_v15 = vld [vmem:[#allocation32_spill] sm:$0xff] }
 0x3c0   :  { %v2716_v55 = vadd.f32 %v2715_v6, %v2653_v49  ;;  %v2128_v49 = vadd.f32 %v5333_v34, %v5652_v40  ;;  %v2663_v61 = vmul.f32 %v2554_v60, %v2215_v31  ;;  %v2664_v42 = vmul.f32 %v2559_v59, %v2216_v53  ;;  %v5659_v59 = vld [vmem:[#allocation48_spill] sm:$0xff] }
 0x3c1   :  { %v2141_v34 = vadd.f32 %v5345_v23, %v5655_v41  ;;  %v2157_v33 = vadd.f32 %v3088_v56, %v5659_v59 }
 0x3c2   :  { %v2717_v27 = vadd.f32 %v2716_v55, %v2654_v25  ;;  %v2574_v25 = vpop.permute.xlu1 %2573  ;;  %v2218_v20 = vmax.f32 %v2128_v49, 0.0  ;;  %v2579_v2 = vpop.permute.xlu0 %2578 }
 0x3c3   :  { %v2667_v38 = vmul.f32 %v2574_v25, %v2219_v21  ;;  %v2668_v18 = vmul.f32 %v2579_v2, %v2220_v35  ;;  %v2225_v62 = vmax.f32 %v2157_v33, 0.0 }
 0x3c4   :  { %v2718_v7 = vadd.f32 %v2717_v27, %v2655_v30  ;;  %v2665_v30 = vmul.f32 %v2564_v50, %v2217_v47  ;;  %v2666_v45 = vmul.f32 %v2569_v58, %v2218_v20 }
 0x3c6   :  { %v2719_v63 = vadd.f32 %v2718_v7, %v2656_v44  ;;  %v2144_v44 = vadd.f32 %v3085_v13, %v5656_v52  ;;  %v2584_v16 = vpop.permute.xlu1 %2583  ;;  %v2151_v7 = vpop.f32.mrf.mxu1 }
 0x3c7   :  { %v2589_v60 = vpop.permute.xlu0 %2588  ;;  %v2152_v4 = vadd.f32 %v2151_v7, %v5658_v1 }
 0x3c8   :  { %v2720_v37 = vadd.f32 %v2719_v63, %v2657_v43  ;;  %v2221_v43 = vmax.f32 %v2141_v34, 0.0 }
 0x3c9   :  { %v2224_v24 = vmax.f32 %v2152_v4, 0.0 }
 0x3ca   :  { %v2721_v32 = vadd.f32 %v2720_v37, %v2658_v12  ;;  %v2222_v12 = vmax.f32 %v2144_v44, 0.0  ;;  %v2669_v37 = vmul.f32 %v2584_v16, %v2221_v43 }
 0x3cb   :  { %v2599_v8 = vpop.permute.xlu0 %2598 }
 0x3cc   :  { %v2722_v39 = vadd.f32 %v2721_v32, %v2659_v29  ;;  %v2594_v29 = vpop.permute.xlu1 %2593  ;;  %v2670_v57 = vmul.f32 %v2589_v60, %v2222_v12  ;;  %v2160_v32 = vadd.f32 %v3089_v48, %v5660_v26  ;;  %v2672_v3 = vmul.f32 %v2599_v8, %v2224_v24 }
 0x3ce   :  { %v2723_v22 = vadd.f32 %v2722_v39, %v2660_v46  ;;  %v2671_v39 = vmul.f32 %v2594_v29, %v2223_v54 }
 0x3d0   :  { %v2724_v28 = vadd.f32 %v2723_v22, %v2661_v19  ;;  %v2226_v19 = vmax.f32 %v2160_v32, 0.0  ;;  %v2604_v31 = vpop.permute.xlu1 %2603 }
 0x3d1   :  { %v2673_v22 = vmul.f32 %v2604_v31, %v2225_v62 }
 0x3d2   :  { %v2725_v6 = vadd.f32 %v2724_v28, %v2662_v17  ;;  %v2609_v17 = vpop.permute.xlu0 %2608 }
 0x3d3   :  { %v2674_v56 = vmul.f32 %v2609_v17, %v2226_v19 }
 0x3d4   :  { %v2726_v55 = vadd.f32 %v2725_v6, %v2663_v61  ;;  %v2748_v61 = vpop.permute.xlu1 %2747 }
 0x3d5   :  { %v2753_v6 = vrot.slane %v2748_v61, %v5661_v15 }
 0x3d6   :  { %v2727_v27 = vadd.f32 %v2726_v55, %v2664_v42 }
 0x3d8   :  { %v2728_v10 = vadd.f32 %v2727_v27, %v2665_v30 }
 0x3da   :  { %v2729_v63 = vadd.f32 %v2728_v10, %v2666_v45 }
 0x3dc   :  { %v2730_v23 = vadd.f32 %v2729_v63, %v2667_v38 }
 0x3de   :  { %v2731_v13 = vadd.f32 %v2730_v23, %v2668_v18 }
 0x3e0   :  { %v2732_v46 = vadd.f32 %v2731_v13, %v2669_v37 }
 0x3e2   :  { %v2733_v50 = vadd.f32 %v2732_v46, %v2670_v57 }
 0x3e4   :  { %v2734_v14 = vadd.f32 %v2733_v50, %v2671_v39 }
 0x3e6   :  { %v2735_v58 = vadd.f32 %v2734_v14, %v2672_v3 }
 0x3e8   :  { %v2736_v40 = vadd.f32 %v2735_v58, %v2673_v22 }
 0x3ea   :  { %v2737_v49 = vadd.f32 %v2736_v40, %v2674_v56 }
 0x3ec   :  { %v2738_v53 = vrot.slane %v2737_v49, 4 }
 0x3ee   :  { %v2739_v28 = vadd.f32 %v2738_v53, %v2737_v49 }
 0x3f0   :  { %v2740_v36 = vrot.slane %v2739_v28, 2 }
 0x3f2   :  { %v2741_v47 = vadd.f32 %v2740_v36, %v2739_v28 }
 0x3f4   :  { %v2742_v0 = vrot.slane %v2741_v47, 1 }
 0x3f6   :  { %v2743_v25 = vadd.f32 %v2742_v0, %v2741_v47 }
 0x3f8   :  { %v2754_v20 = vadd.f32 %v2753_v6, %v2743_v25 }
 0x3fa   :  { %v2841_v42 = vmul.f32 -1.442695, %v2754_v20 }
 0x3fc   :  { %3206 = vpow2.f32 %v2841_v42 }
 0x409   :  { %v3207_v51 = vpop.eup %3206 }
 0x40a   :  { %v2758_v11 = vadd.f32 1.0, %v3207_v51 }
 0x40c   :  { %3208 = vrcp.f32 %v2758_v11 }
 0x419   :  { %v3209_v55 = vpop.eup %3208 }
 0x41a   :  { %2761 = vst [vmem:[#allocation3] sm:$0x1] %v3209_v55 }
 0x41b   :  { %3221 = shalt.err (!%p3218_p4)
}
 0x41c   :  { %2771 = dma.vmem_to_hbm [thread:$0]  %s2769_s30, 16, %s5388_s9, [#allocation4]  }
 0x41d   :  { %3230 = dma.done.wait [#allocation4], 16  }
 0x41e   :  { %3231 = vsyncadd [#allocation4], 4294967280 }
 0x41f   :  { %2775 = vsyncpa [#allocation4], 1 }

</bundles_post_ra>
